<compile_context>
chip_gen: v7x
topology: tpu7x:2x2x1
jax: 0.10.0
libtpu: 0.0.40
codegen_flags: <defaults>
</compile_context>

<pallas_src>
import functools
import math

import jax
import jax.numpy as jnp
from jax.experimental import pallas as pl
from jax.experimental.pallas import tpu as pltpu


# ------------------------------ in-kernel helpers ------------------------------

def _bf16_dot(a, b):
    # Single-pass bf16 MXU matmul, f32 accumulation.
    return jnp.dot(a.astype(jnp.bfloat16), b.astype(jnp.bfloat16),
                   preferred_element_type=jnp.float32)


def _bf16_dot_nt(a, b):
    # a @ b.T contracting the last dims natively (no materialized transpose).
    return jax.lax.dot_general(
        a.astype(jnp.bfloat16), b.astype(jnp.bfloat16),
        dimension_numbers=(((1,), (1,)), ((), ())),
        preferred_element_type=jnp.float32)


def _layernorm(x, g, b, eps=1e-5):
    mean = jnp.mean(x, axis=-1, keepdims=True)
    var = jnp.mean(jnp.square(x - mean), axis=-1, keepdims=True)
    return (x - mean) * jax.lax.rsqrt(var + eps) * g + b


def _gelu(x):  # exact erf GELU == torch.nn.GELU() default
    return 0.5 * x * (1.0 + jax.lax.erf(x * (1.0 / math.sqrt(2.0))))


# ------------------------------ fused Pallas kernel ------------------------------

def _make_fused_kernel(treedef, *, BB, T, S, emb_dim, num_head):
    """One grid step processes BB batches end-to-end (all layers)."""
    Dh = emb_dim // num_head
    scale = Dh ** -0.5

    def kernel(*refs):
        *in_refs, out_ref = refs
        ctx_ref, dom_ref, mask_ref, p = jax.tree_util.tree_unflatten(treedef, in_refs)

        # ---- context path: predictor_embed -> [concat domain] -> context_mixer ----
        # concat([ctx, dom], -1) @ Wcm == ctx @ Wcm[:E] + dom @ Wcm[E:]  (exact split,
        # avoids an in-kernel lane concat of activations with the weight).
        ctx = (_bf16_dot(ctx_ref[...], p["predictor_embed"]["w"][...])
               + p["predictor_embed"]["b"][...])
        wcm = p["context_mixer"]["w"][...]
        y = (_bf16_dot(ctx, wcm[:emb_dim, :])
             + _bf16_dot(dom_ref[...], wcm[emb_dim:, :])
             + p["context_mixer"]["b"][...])                                   # (BB*S, E) f32

        # ---- target-token path ----
        x = mask_ref[...]                                                      # (BB*T, E) f32

        # Additive block-diagonal mask: all BB per-batch attentions run as ONE MXU
        # matmul per head; cross-batch scores get -1e30 so softmax zeroes them.
        if BB > 1:
            row_b = jax.lax.broadcasted_iota(jnp.int32, (BB * T, BB * S), 0) // T
            col_b = jax.lax.broadcasted_iota(jnp.int32, (BB * T, BB * S), 1) // S
            neg_mask = jnp.where(row_b == col_b, 0.0, -1e30).astype(jnp.float32)
        else:
            neg_mask = None

        for lp in p["layers"]:
            # cross-attention: x = x + proj(MHA(LN1(x) as q, LN0(y) as k/v))
            xq = _layernorm(x, lp["norm1"]["g"][...], lp["norm1"]["b"][...])
            yk = _layernorm(y, lp["norm0"]["g"][...], lp["norm0"]["b"][...])
            q2 = _bf16_dot(xq, lp["q"]["w"][...])                              # (BB*T, E), qkv_bias=False
            kv2 = _bf16_dot(yk, lp["kv"]["w"][...])                            # (BB*S, 2E)

            heads = []
            for h in range(num_head):                                          # short static loop
                qh = q2[:, h * Dh:(h + 1) * Dh]                                # (BB*T, Dh)
                kh = kv2[:, h * Dh:(h + 1) * Dh]                               # (BB*S, Dh)
                vh = kv2[:, emb_dim + h * Dh:emb_dim + (h + 1) * Dh]           # (BB*S, Dh)
                s = _bf16_dot_nt(qh, kh) * scale                               # (BB*T, BB*S)
                if neg_mask is not None:
                    s = s + neg_mask
                s = s - jnp.max(s, axis=-1, keepdims=True)
                e = jnp.exp(s)
                a = e * pl.reciprocal(jnp.sum(e, axis=-1, keepdims=True), approx=True)
                heads.append(_bf16_dot(a, vh))                                 # (BB*T, Dh)
            o = jnp.concatenate(heads, axis=-1)                                # (BB*T, E)
            # one full-contraction-depth proj matmul; bias + residual folded in (no scratch)
            x = x + _bf16_dot(o, lp["proj"]["w"][...]) + lp["proj"]["b"][...]

            # MLP: x = x + fc2(GELU(fc1(LN2(x))))
            h2 = _layernorm(x, lp["norm2"]["g"][...], lp["norm2"]["b"][...])
            h2 = _gelu(_bf16_dot(h2, lp["fc1"]["w"][...]) + lp["fc1"]["b"][...])
            x = x + _bf16_dot(h2, lp["fc2"]["w"][...]) + lp["fc2"]["b"][...]

        x = _layernorm(x, p["norm"]["g"][...], p["norm"]["b"][...])
        out = _bf16_dot(x, p["projector_embed"]["w"][...]) + p["projector_embed"]["b"][...]
        out_ref[...] = out.astype(out_ref.dtype)

    return kernel


# ------------------------------ wrapper ------------------------------

def _cast_matmul_weights_bf16(params):
    """bf16 matmul weights (single MXU pass); biases / LN params stay f32."""
    def cast_w(d):
        return {k: (v.astype(jnp.bfloat16) if k == "w" else v) for k, v in d.items()}

    return {
        "predictor_embed": cast_w(params["predictor_embed"]),
        "context_mixer": cast_w(params["context_mixer"]),
        "projector_embed": cast_w(params["projector_embed"]),
        "norm": params["norm"],
        "layers": [
            {
                "norm0": lp["norm0"], "norm1": lp["norm1"], "norm2": lp["norm2"],
                "q": cast_w(lp["q"]), "kv": cast_w(lp["kv"]), "proj": cast_w(lp["proj"]),
                "fc1": cast_w(lp["fc1"]), "fc2": cast_w(lp["fc2"]),
            }
            for lp in params["layers"]
        ],
    }


def iwm_predictor_forward_pallas(params, context_emb, target_masks, target_domain,
                                 num_head, *, batch_block=1):
    t, b = target_masks.shape
    if len(target_domain) == 1:
        target_domain = list(target_domain) * b
    B, S, c_in = context_emb.shape
    assert B == b, (B, b)
    emb_dim = params["mask_token"].shape[-1]
    input_dim = params["projector_embed"]["w"].shape[1]
    assert emb_dim % num_head == 0, (emb_dim, num_head)
    assert B % batch_block == 0, (B, batch_block)
    BB = batch_block
    # sublane alignment of the per-step activation blocks (or full-array block)
    assert BB == B or ((BB * t) % 8 == 0 and (BB * S) % 8 == 0), (BB, t, S)

    # ---- tiny data-/string-dependent prep in plain JAX ----
    dom = jnp.concatenate([params["domain_embeddings"][td] for td in target_domain], axis=0)  # (B,1,E)
    dom2d = jnp.broadcast_to(dom, (B, S, emb_dim)).reshape(B * S, emb_dim)
    pe = params["pos_embedding"][:, 0, :][target_masks]                                       # take_indexes -> (t,B,E)
    mask = params["mask_token"] + pe                                                          # (t,B,E)
    mask2d = jnp.transpose(mask, (1, 0, 2)).reshape(B * t, emb_dim)                           # 't b c -> b t c'

    kparams = _cast_matmul_weights_bf16(params)
    flat_inputs, treedef = jax.tree_util.tree_flatten(
        (context_emb.reshape(B * S, c_in), dom2d, mask2d, kparams))

    # Activations are tiled over the batch-block grid; every weight leaf is a whole-array
    # block with a constant index_map (same block each step -> DMA'd into VMEM only once).
    data_specs = [
        pl.BlockSpec((BB * S, c_in), lambda i: (i, 0)),
        pl.BlockSpec((BB * S, emb_dim), lambda i: (i, 0)),
        pl.BlockSpec((BB * t, emb_dim), lambda i: (i, 0)),
    ]
    weight_specs = [pl.BlockSpec(leaf.shape, lambda i: (0, 0)) for leaf in flat_inputs[3:]]

    kernel = _make_fused_kernel(treedef, BB=BB, T=t, S=S, emb_dim=emb_dim, num_head=num_head)
    out2d = pl.pallas_call(
        kernel,
        out_shape=jax.ShapeDtypeStruct((B * t, input_dim), context_emb.dtype),
        grid=(B // BB,),
        in_specs=data_specs + weight_specs,
        out_specs=pl.BlockSpec((BB * t, input_dim), lambda i: (i, 0)),
        compiler_params=pltpu.CompilerParams(
            dimension_semantics=("parallel",),       # v7x: shard batch blocks over both TCs
            vmem_limit_bytes=32 * 1024 * 1024),
    )(*flat_inputs)
    return out2d.reshape(B, t, input_dim)


# ------------------------------ pure-JAX reference ------------------------------

def _ref_ln(x, g, b, eps=1e-5):
    m = jnp.mean(x, axis=-1, keepdims=True)
    v = jnp.mean(jnp.square(x - m), axis=-1, keepdims=True)
    return (x - m) * jax.lax.rsqrt(v + eps) * g[0] + b[0]


def iwm_predictor_forward_ref(params, context_emb, target_masks, target_domain, num_head):
    P = jax.lax.Precision.HIGHEST
    mm = functools.partial(jnp.matmul, precision=P)
    t, b = target_masks.shape
    if len(target_domain) == 1:
        target_domain = list(target_domain) * b
    emb_dim = params["mask_token"].shape[-1]
    H = num_head
    Dh = emb_dim // H

    ctx = mm(context_emb, params["predictor_embed"]["w"]) + params["predictor_embed"]["b"][0]
    dom = jnp.concatenate([params["domain_embeddings"][td] for td in target_domain], axis=0)
    dom = jnp.broadcast_to(dom, (b, ctx.shape[1], emb_dim))
    ctx = jnp.concatenate([ctx, dom], axis=-1)
    ctx = mm(ctx, params["context_mixer"]["w"]) + params["context_mixer"]["b"][0]

    pe = params["pos_embedding"][:, 0, :][target_masks]
    x = params["mask_token"] + pe
    x = jnp.transpose(x, (1, 0, 2))                         # (b, t, E)

    B_, T_, _ = x.shape
    S_ = ctx.shape[1]
    for lp in params["layers"]:
        xq = _ref_ln(x, lp["norm1"]["g"], lp["norm1"]["b"])
        yk = _ref_ln(ctx, lp["norm0"]["g"], lp["norm0"]["b"])
        q = mm(xq, lp["q"]["w"])
        kv = mm(yk, lp["kv"]["w"])
        k, v = kv[..., :emb_dim], kv[..., emb_dim:]
        qh = q.reshape(B_, T_, H, Dh).transpose(0, 2, 1, 3)
        kh = k.reshape(B_, S_, H, Dh).transpose(0, 2, 1, 3)
        vh = v.reshape(B_, S_, H, Dh).transpose(0, 2, 1, 3)
        s = jnp.einsum("bhtd,bhsd->bhts", qh, kh, precision=P) * (Dh ** -0.5)
        a = jax.nn.softmax(s, axis=-1)
        o = jnp.einsum("bhts,bhsd->bhtd", a, vh, precision=P)
        o = o.transpose(0, 2, 1, 3).reshape(B_, T_, emb_dim)
        x = x + mm(o, lp["proj"]["w"]) + lp["proj"]["b"][0]
        hh = _ref_ln(x, lp["norm2"]["g"], lp["norm2"]["b"])
        hh = mm(hh, lp["fc1"]["w"]) + lp["fc1"]["b"][0]
        hh = 0.5 * hh * (1.0 + jax.lax.erf(hh * (1.0 / math.sqrt(2.0))))
        hh = mm(hh, lp["fc2"]["w"]) + lp["fc2"]["b"][0]
        x = x + hh

    x = _ref_ln(x, params["norm"]["g"], params["norm"]["b"])
    return mm(x, params["projector_embed"]["w"]) + params["projector_embed"]["b"][0]


# ------------------------------ parameter init ------------------------------

def init_params(key, domains, n_pos, input_dim, emb_dim, num_layer, mlp_ratio=4):
    keys = iter(jax.random.split(key, 256))

    def nrm(shape, std=0.02):
        return (std * jax.random.normal(next(keys), shape)).astype(jnp.float32)

    ones_row = lambda d: jnp.ones((1, d), jnp.float32)
    zeros_row = lambda d: jnp.zeros((1, d), jnp.float32)

    p = {
        "mask_token": nrm((1, 1, emb_dim)),
        "pos_embedding": nrm((n_pos, 1, emb_dim)),   # learnable pos embedding, no cls token
        "predictor_embed": {"w": nrm((input_dim, emb_dim), 0.05), "b": nrm((1, emb_dim))},
        "projector_embed": {"w": nrm((emb_dim, input_dim), 0.05), "b": nrm((1, input_dim))},
        "norm": {"g": ones_row(emb_dim), "b": zeros_row(emb_dim)},
        # torch inits domain embeddings to zeros; random here so the domain path is exercised.
        "domain_embeddings": {d: nrm((1, 1, emb_dim)) for d in domains},
        "context_mixer": {"w": nrm((2 * emb_dim, emb_dim), 0.05), "b": nrm((1, emb_dim))},
    }
    hidden = emb_dim * mlp_ratio
    layers = []
    for _ in range(num_layer):
        layers.append({
            "norm0": {"g": ones_row(emb_dim), "b": zeros_row(emb_dim)},
            "norm1": {"g": ones_row(emb_dim), "b": zeros_row(emb_dim)},
            "norm2": {"g": ones_row(emb_dim), "b": zeros_row(emb_dim)},
            "q":   {"w": nrm((emb_dim, emb_dim), 0.05)},        # qkv_bias=False -> no bias
            "kv":  {"w": nrm((emb_dim, 2 * emb_dim), 0.05)},    # qkv_bias=False -> no bias
            "proj": {"w": nrm((emb_dim, emb_dim), 0.05), "b": nrm((1, emb_dim))},
            "fc1": {"w": nrm((emb_dim, hidden), 0.05), "b": nrm((1, hidden))},
            "fc2": {"w": nrm((hidden, emb_dim), 0.05), "b": nrm((1, emb_dim))},
        })
    p["layers"] = layers
    return p


# ----------------------------------- main -----------------------------------

if __name__ == "__main__":
    domains = ["brightfield", "struct"]
    spatial_dims = 2
    num_patches = 4                       # per-dim -> 4*4 = 16 positional tokens
    input_dim, emb_dim = 16, 32
    num_layer, num_head = 2, 2
    B, N_CTX, T = 2, 8, 8                 # T, N_CTX multiples of 8 keep blocks sublane-aligned

    key = jax.random.PRNGKey(0)
    kp, kc, km = jax.random.split(key, 3)
    params = init_params(kp, domains, num_patches ** spatial_dims,
                         input_dim, emb_dim, num_layer)

    context_emb = jax.random.normal(kc, (B, N_CTX, input_dim), jnp.float32)
    target_masks = jax.random.randint(km, (T, B), 0, num_patches ** spatial_dims).astype(jnp.int32)
    target_domain = ["struct"]            # single entry -> broadcast to batch, as in torch forward

    ref = jax.block_until_ready(
        iwm_predictor_forward_ref(params, context_emb, target_masks, target_domain, num_head))
    # bf16-operand matmuls vs f32 HIGHEST reference -> use a widened (relative) tolerance.
    tol = 5e-2 * max(1.0, float(jnp.max(jnp.abs(ref))))

    # batch_block=1: grid=(B,) "parallel" -> batch blocks shard over v7x's 2 TensorCores.
    # batch_block=B: grid=(1,) -> all B per-batch attentions fused into one masked MXU
    #                matmul per head (fewest MXU pushes on single-TC v5e/v6e).
    for bb in (1, B):
        out = iwm_predictor_forward_pallas(params, context_emb, target_masks, target_domain,
                                           num_head, batch_block=bb)
        out = jax.block_until_ready(out)
        assert out.shape == (B, T, input_dim), out.shape
        max_err = float(jnp.max(jnp.abs(out - ref)))
        assert max_err < tol, f"batch_block={bb}: mismatch vs reference: {max_err} (tol {tol})"

    print("KERNEL_OK")
</pallas_src>

<mosaic_0001>
module attributes {stable_mosaic.version = 11 : i64} {
  func.func @kernel(%arg0: i32, %arg1: memref<8x16xf32, #tpu.memory_space<vmem>>, %arg2: memref<8x32xf32, #tpu.memory_space<vmem>>, %arg3: memref<8x32xf32, #tpu.memory_space<vmem>>, %arg4: memref<1x32xf32, #tpu.memory_space<vmem>>, %arg5: memref<64x32xbf16, #tpu.memory_space<vmem>>, %arg6: memref<1x128xf32, #tpu.memory_space<vmem>>, %arg7: memref<32x128xbf16, #tpu.memory_space<vmem>>, %arg8: memref<1x32xf32, #tpu.memory_space<vmem>>, %arg9: memref<128x32xbf16, #tpu.memory_space<vmem>>, %arg10: memref<32x64xbf16, #tpu.memory_space<vmem>>, %arg11: memref<1x32xf32, #tpu.memory_space<vmem>>, %arg12: memref<1x32xf32, #tpu.memory_space<vmem>>, %arg13: memref<1x32xf32, #tpu.memory_space<vmem>>, %arg14: memref<1x32xf32, #tpu.memory_space<vmem>>, %arg15: memref<1x32xf32, #tpu.memory_space<vmem>>, %arg16: memref<1x32xf32, #tpu.memory_space<vmem>>, %arg17: memref<1x32xf32, #tpu.memory_space<vmem>>, %arg18: memref<32x32xbf16, #tpu.memory_space<vmem>>, %arg19: memref<32x32xbf16, #tpu.memory_space<vmem>>, %arg20: memref<1x128xf32, #tpu.memory_space<vmem>>, %arg21: memref<32x128xbf16, #tpu.memory_space<vmem>>, %arg22: memref<1x32xf32, #tpu.memory_space<vmem>>, %arg23: memref<128x32xbf16, #tpu.memory_space<vmem>>, %arg24: memref<32x64xbf16, #tpu.memory_space<vmem>>, %arg25: memref<1x32xf32, #tpu.memory_space<vmem>>, %arg26: memref<1x32xf32, #tpu.memory_space<vmem>>, %arg27: memref<1x32xf32, #tpu.memory_space<vmem>>, %arg28: memref<1x32xf32, #tpu.memory_space<vmem>>, %arg29: memref<1x32xf32, #tpu.memory_space<vmem>>, %arg30: memref<1x32xf32, #tpu.memory_space<vmem>>, %arg31: memref<1x32xf32, #tpu.memory_space<vmem>>, %arg32: memref<32x32xbf16, #tpu.memory_space<vmem>>, %arg33: memref<32x32xbf16, #tpu.memory_space<vmem>>, %arg34: memref<1x32xf32, #tpu.memory_space<vmem>>, %arg35: memref<1x32xf32, #tpu.memory_space<vmem>>, %arg36: memref<1x32xf32, #tpu.memory_space<vmem>>, %arg37: memref<16x32xbf16, #tpu.memory_space<vmem>>, %arg38: memref<1x16xf32, #tpu.memory_space<vmem>>, %arg39: memref<32x16xbf16, #tpu.memory_space<vmem>>, %arg40: memref<8x16xf32, #tpu.memory_space<vmem>>) attributes {dimension_semantics = [#tpu.dimension_semantics<parallel>], iteration_bounds = array<i64: 2>, scalar_prefetch = 0 : i64, scratch_operands = 0 : i64, tpu.core_type = #tpu.core_type<tc>, window_params = [{transform_indices = @transform_0, window_bounds = array<i64: 8, 16>}, {transform_indices = @transform_1, window_bounds = array<i64: 8, 32>}, {transform_indices = @transform_2, window_bounds = array<i64: 8, 32>}, {pipeline_mode = #tpu.pipeline_mode<synchronous>, transform_indices = @transform_3, window_bounds = array<i64: 1, 32>}, {pipeline_mode = #tpu.pipeline_mode<synchronous>, transform_indices = @transform_4, window_bounds = array<i64: 64, 32>}, {pipeline_mode = #tpu.pipeline_mode<synchronous>, transform_indices = @transform_5, window_bounds = array<i64: 1, 128>}, {pipeline_mode = #tpu.pipeline_mode<synchronous>, transform_indices = @transform_6, window_bounds = array<i64: 32, 128>}, {pipeline_mode = #tpu.pipeline_mode<synchronous>, transform_indices = @transform_7, window_bounds = array<i64: 1, 32>}, {pipeline_mode = #tpu.pipeline_mode<synchronous>, transform_indices = @transform_8, window_bounds = array<i64: 128, 32>}, {pipeline_mode = #tpu.pipeline_mode<synchronous>, transform_indices = @transform_9, window_bounds = array<i64: 32, 64>}, {pipeline_mode = #tpu.pipeline_mode<synchronous>, transform_indices = @transform_10, window_bounds = array<i64: 1, 32>}, {pipeline_mode = #tpu.pipeline_mode<synchronous>, transform_indices = @transform_11, window_bounds = array<i64: 1, 32>}, {pipeline_mode = #tpu.pipeline_mode<synchronous>, transform_indices = @transform_12, window_bounds = array<i64: 1, 32>}, {pipeline_mode = #tpu.pipeline_mode<synchronous>, transform_indices = @transform_13, window_bounds = array<i64: 1, 32>}, {pipeline_mode = #tpu.pipeline_mode<synchronous>, transform_indices = @transform_14, window_bounds = array<i64: 1, 32>}, {pipeline_mode = #tpu.pipeline_mode<synchronous>, transform_indices = @transform_15, window_bounds = array<i64: 1, 32>}, {pipeline_mode = #tpu.pipeline_mode<synchronous>, transform_indices = @transform_16, window_bounds = array<i64: 1, 32>}, {pipeline_mode = #tpu.pipeline_mode<synchronous>, transform_indices = @transform_17, window_bounds = array<i64: 32, 32>}, {pipeline_mode = #tpu.pipeline_mode<synchronous>, transform_indices = @transform_18, window_bounds = array<i64: 32, 32>}, {pipeline_mode = #tpu.pipeline_mode<synchronous>, transform_indices = @transform_19, window_bounds = array<i64: 1, 128>}, {pipeline_mode = #tpu.pipeline_mode<synchronous>, transform_indices = @transform_20, window_bounds = array<i64: 32, 128>}, {pipeline_mode = #tpu.pipeline_mode<synchronous>, transform_indices = @transform_21, window_bounds = array<i64: 1, 32>}, {pipeline_mode = #tpu.pipeline_mode<synchronous>, transform_indices = @transform_22, window_bounds = array<i64: 128, 32>}, {pipeline_mode = #tpu.pipeline_mode<synchronous>, transform_indices = @transform_23, window_bounds = array<i64: 32, 64>}, {pipeline_mode = #tpu.pipeline_mode<synchronous>, transform_indices = @transform_24, window_bounds = array<i64: 1, 32>}, {pipeline_mode = #tpu.pipeline_mode<synchronous>, transform_indices = @transform_25, window_bounds = array<i64: 1, 32>}, {pipeline_mode = #tpu.pipeline_mode<synchronous>, transform_indices = @transform_26, window_bounds = array<i64: 1, 32>}, {pipeline_mode = #tpu.pipeline_mode<synchronous>, transform_indices = @transform_27, window_bounds = array<i64: 1, 32>}, {pipeline_mode = #tpu.pipeline_mode<synchronous>, transform_indices = @transform_28, window_bounds = array<i64: 1, 32>}, {pipeline_mode = #tpu.pipeline_mode<synchronous>, transform_indices = @transform_29, window_bounds = array<i64: 1, 32>}, {pipeline_mode = #tpu.pipeline_mode<synchronous>, transform_indices = @transform_30, window_bounds = array<i64: 1, 32>}, {pipeline_mode = #tpu.pipeline_mode<synchronous>, transform_indices = @transform_31, window_bounds = array<i64: 32, 32>}, {pipeline_mode = #tpu.pipeline_mode<synchronous>, transform_indices = @transform_32, window_bounds = array<i64: 32, 32>}, {pipeline_mode = #tpu.pipeline_mode<synchronous>, transform_indices = @transform_33, window_bounds = array<i64: 1, 32>}, {pipeline_mode = #tpu.pipeline_mode<synchronous>, transform_indices = @transform_34, window_bounds = array<i64: 1, 32>}, {pipeline_mode = #tpu.pipeline_mode<synchronous>, transform_indices = @transform_35, window_bounds = array<i64: 1, 32>}, {pipeline_mode = #tpu.pipeline_mode<synchronous>, transform_indices = @transform_36, window_bounds = array<i64: 16, 32>}, {pipeline_mode = #tpu.pipeline_mode<synchronous>, transform_indices = @transform_37, window_bounds = array<i64: 1, 16>}, {pipeline_mode = #tpu.pipeline_mode<synchronous>, transform_indices = @transform_38, window_bounds = array<i64: 32, 16>}, {transform_indices = @transform_39, window_bounds = array<i64: 8, 16>}]} {
    %c0 = arith.constant 0 : index
    %c0_0 = arith.constant 0 : index
    %0 = vector.load %arg1[%c0, %c0_0] : memref<8x16xf32, #tpu.memory_space<vmem>>, vector<8x16xf32>
    %c0_1 = arith.constant 0 : index
    %c0_2 = arith.constant 0 : index
    %1 = vector.load %arg37[%c0_1, %c0_2] : memref<16x32xbf16, #tpu.memory_space<vmem>>, vector<16x32xbf16>
    %2 = arith.truncf %0 : vector<8x16xf32> to vector<8x16xbf16>
    %cst = arith.constant dense<0.000000e+00> : vector<8x32xf32>
    %3 = tpu.matmul %2, %1, %cst {dimension_numbers = #tpu.dot_dimension_numbers<[1], [0], [0], [1], [0, 0, 1, 1], [], []>} : vector<8x16xbf16>, vector<16x32xbf16>, vector<8x32xf32> -> vector<8x32xf32>
    %c0_3 = arith.constant 0 : index
    %c0_4 = arith.constant 0 : index
    %4 = vector.load %arg36[%c0_3, %c0_4] : memref<1x32xf32, #tpu.memory_space<vmem>>, vector<1x32xf32>
    %5 = vector.broadcast %4 : vector<1x32xf32> to vector<8x32xf32>
    %6 = arith.addf %3, %5 : vector<8x32xf32>
    %c0_5 = arith.constant 0 : index
    %c0_6 = arith.constant 0 : index
    %7 = vector.load %arg5[%c0_5, %c0_6] : memref<64x32xbf16, #tpu.memory_space<vmem>>, vector<64x32xbf16>
    %8 = vector.extract_strided_slice %7 {offsets = [0, 0], sizes = [32, 32], strides = [1, 1]} : vector<64x32xbf16> to vector<32x32xbf16>
    %9 = arith.truncf %6 : vector<8x32xf32> to vector<8x32xbf16>
    %cst_7 = arith.constant dense<0.000000e+00> : vector<8x32xf32>
    %10 = tpu.matmul %9, %8, %cst_7 {dimension_numbers = #tpu.dot_dimension_numbers<[1], [0], [0], [1], [0, 0, 1, 1], [], []>} : vector<8x32xbf16>, vector<32x32xbf16>, vector<8x32xf32> -> vector<8x32xf32>
    %c0_8 = arith.constant 0 : index
    %c0_9 = arith.constant 0 : index
    %11 = vector.load %arg2[%c0_8, %c0_9] : memref<8x32xf32, #tpu.memory_space<vmem>>, vector<8x32xf32>
    %12 = vector.extract_strided_slice %7 {offsets = [32, 0], sizes = [32, 32], strides = [1, 1]} : vector<64x32xbf16> to vector<32x32xbf16>
    %13 = arith.truncf %11 : vector<8x32xf32> to vector<8x32xbf16>
    %cst_10 = arith.constant dense<0.000000e+00> : vector<8x32xf32>
    %14 = tpu.matmul %13, %12, %cst_10 {dimension_numbers = #tpu.dot_dimension_numbers<[1], [0], [0], [1], [0, 0, 1, 1], [], []>} : vector<8x32xbf16>, vector<32x32xbf16>, vector<8x32xf32> -> vector<8x32xf32>
    %15 = arith.addf %10, %14 : vector<8x32xf32>
    %c0_11 = arith.constant 0 : index
    %c0_12 = arith.constant 0 : index
    %16 = vector.load %arg4[%c0_11, %c0_12] : memref<1x32xf32, #tpu.memory_space<vmem>>, vector<1x32xf32>
    %17 = vector.broadcast %16 : vector<1x32xf32> to vector<8x32xf32>
    %18 = arith.addf %15, %17 : vector<8x32xf32>
    %c0_13 = arith.constant 0 : index
    %c0_14 = arith.constant 0 : index
    %19 = vector.load %arg3[%c0_13, %c0_14] : memref<8x32xf32, #tpu.memory_space<vmem>>, vector<8x32xf32>
    %c0_15 = arith.constant 0 : index
    %c0_16 = arith.constant 0 : index
    %20 = vector.load %arg14[%c0_15, %c0_16] : memref<1x32xf32, #tpu.memory_space<vmem>>, vector<1x32xf32>
    %c0_17 = arith.constant 0 : index
    %c0_18 = arith.constant 0 : index
    %21 = vector.load %arg13[%c0_17, %c0_18] : memref<1x32xf32, #tpu.memory_space<vmem>>, vector<1x32xf32>
    %cst_19 = arith.constant dense<0.000000e+00> : vector<8xf32>
    %22 = vector.multi_reduction <add>, %19, %cst_19 [1] : vector<8x32xf32> to vector<8xf32>
    %23 = vector.shape_cast %22 : vector<8xf32> to vector<8x1xf32>
    %cst_20 = arith.constant 3.200000e+01 : f32
    %24 = vector.broadcast %cst_20 : f32 to vector<8x1xf32>
    %25 = arith.divf %23, %24 : vector<8x1xf32>
    %26 = vector.broadcast %25 : vector<8x1xf32> to vector<8x32xf32>
    %27 = arith.subf %19, %26 : vector<8x32xf32>
    %28 = arith.mulf %27, %27 : vector<8x32xf32>
    %cst_21 = arith.constant dense<0.000000e+00> : vector<8xf32>
    %29 = vector.multi_reduction <add>, %28, %cst_21 [1] : vector<8x32xf32> to vector<8xf32>
    %30 = vector.shape_cast %29 : vector<8xf32> to vector<8x1xf32>
    %cst_22 = arith.constant 3.200000e+01 : f32
    %31 = vector.broadcast %cst_22 : f32 to vector<8x1xf32>
    %32 = arith.divf %30, %31 : vector<8x1xf32>
    %33 = vector.broadcast %25 : vector<8x1xf32> to vector<8x32xf32>
    %34 = arith.subf %19, %33 : vector<8x32xf32>
    %cst_23 = arith.constant 9.99999974E-6 : f32
    %35 = vector.broadcast %cst_23 : f32 to vector<8x1xf32>
    %36 = arith.addf %32, %35 : vector<8x1xf32>
    %37 = math.rsqrt %36 : vector<8x1xf32>
    %38 = vector.broadcast %37 : vector<8x1xf32> to vector<8x32xf32>
    %39 = arith.mulf %34, %38 : vector<8x32xf32>
    %40 = vector.broadcast %20 : vector<1x32xf32> to vector<8x32xf32>
    %41 = arith.mulf %39, %40 : vector<8x32xf32>
    %42 = vector.broadcast %21 : vector<1x32xf32> to vector<8x32xf32>
    %43 = arith.addf %41, %42 : vector<8x32xf32>
    %c0_24 = arith.constant 0 : index
    %c0_25 = arith.constant 0 : index
    %44 = vector.load %arg12[%c0_24, %c0_25] : memref<1x32xf32, #tpu.memory_space<vmem>>, vector<1x32xf32>
    %c0_26 = arith.constant 0 : index
    %c0_27 = arith.constant 0 : index
    %45 = vector.load %arg11[%c0_26, %c0_27] : memref<1x32xf32, #tpu.memory_space<vmem>>, vector<1x32xf32>
    %cst_28 = arith.constant dense<0.000000e+00> : vector<8xf32>
    %46 = vector.multi_reduction <add>, %18, %cst_28 [1] : vector<8x32xf32> to vector<8xf32>
    %47 = vector.shape_cast %46 : vector<8xf32> to vector<8x1xf32>
    %cst_29 = arith.constant 3.200000e+01 : f32
    %48 = vector.broadcast %cst_29 : f32 to vector<8x1xf32>
    %49 = arith.divf %47, %48 : vector<8x1xf32>
    %50 = vector.broadcast %49 : vector<8x1xf32> to vector<8x32xf32>
    %51 = arith.subf %18, %50 : vector<8x32xf32>
    %52 = arith.mulf %51, %51 : vector<8x32xf32>
    %cst_30 = arith.constant dense<0.000000e+00> : vector<8xf32>
    %53 = vector.multi_reduction <add>, %52, %cst_30 [1] : vector<8x32xf32> to vector<8xf32>
    %54 = vector.shape_cast %53 : vector<8xf32> to vector<8x1xf32>
    %cst_31 = arith.constant 3.200000e+01 : f32
    %55 = vector.broadcast %cst_31 : f32 to vector<8x1xf32>
    %56 = arith.divf %54, %55 : vector<8x1xf32>
    %57 = vector.broadcast %49 : vector<8x1xf32> to vector<8x32xf32>
    %58 = arith.subf %18, %57 : vector<8x32xf32>
    %cst_32 = arith.constant 9.99999974E-6 : f32
    %59 = vector.broadcast %cst_32 : f32 to vector<8x1xf32>
    %60 = arith.addf %56, %59 : vector<8x1xf32>
    %61 = math.rsqrt %60 : vector<8x1xf32>
    %62 = vector.broadcast %61 : vector<8x1xf32> to vector<8x32xf32>
    %63 = arith.mulf %58, %62 : vector<8x32xf32>
    %64 = vector.broadcast %44 : vector<1x32xf32> to vector<8x32xf32>
    %65 = arith.mulf %63, %64 : vector<8x32xf32>
    %66 = vector.broadcast %45 : vector<1x32xf32> to vector<8x32xf32>
    %67 = arith.addf %65, %66 : vector<8x32xf32>
    %c0_33 = arith.constant 0 : index
    %c0_34 = arith.constant 0 : index
    %68 = vector.load %arg19[%c0_33, %c0_34] : memref<32x32xbf16, #tpu.memory_space<vmem>>, vector<32x32xbf16>
    %69 = arith.truncf %43 : vector<8x32xf32> to vector<8x32xbf16>
    %cst_35 = arith.constant dense<0.000000e+00> : vector<8x32xf32>
    %70 = tpu.matmul %69, %68, %cst_35 {dimension_numbers = #tpu.dot_dimension_numbers<[1], [0], [0], [1], [0, 0, 1, 1], [], []>} : vector<8x32xbf16>, vector<32x32xbf16>, vector<8x32xf32> -> vector<8x32xf32>
    %c0_36 = arith.constant 0 : index
    %c0_37 = arith.constant 0 : index
    %71 = vector.load %arg10[%c0_36, %c0_37] : memref<32x64xbf16, #tpu.memory_space<vmem>>, vector<32x64xbf16>
    %72 = arith.truncf %67 : vector<8x32xf32> to vector<8x32xbf16>
    %cst_38 = arith.constant dense<0.000000e+00> : vector<8x64xf32>
    %73 = tpu.matmul %72, %71, %cst_38 {dimension_numbers = #tpu.dot_dimension_numbers<[1], [0], [0], [1], [0, 0, 1, 1], [], []>} : vector<8x32xbf16>, vector<32x64xbf16>, vector<8x64xf32> -> vector<8x64xf32>
    %74 = vector.extract_strided_slice %70 {offsets = [0, 0], sizes = [8, 16], strides = [1, 1]} : vector<8x32xf32> to vector<8x16xf32>
    %75 = vector.extract_strided_slice %73 {offsets = [0, 0], sizes = [8, 16], strides = [1, 1]} : vector<8x64xf32> to vector<8x16xf32>
    %76 = vector.extract_strided_slice %73 {offsets = [0, 32], sizes = [8, 16], strides = [1, 1]} : vector<8x64xf32> to vector<8x16xf32>
    %77 = arith.truncf %74 : vector<8x16xf32> to vector<8x16xbf16>
    %78 = arith.truncf %75 : vector<8x16xf32> to vector<8x16xbf16>
    %cst_39 = arith.constant dense<0.000000e+00> : vector<8x8xf32>
    %79 = tpu.matmul %77, %78, %cst_39 {dimension_numbers = #tpu.dot_dimension_numbers<[1], [1], [0], [0], [0, 0, 1, 0], [], []>} : vector<8x16xbf16>, vector<8x16xbf16>, vector<8x8xf32> -> vector<8x8xf32>
    %cst_40 = arith.constant 2.500000e-01 : f32
    %80 = vector.broadcast %cst_40 : f32 to vector<8x8xf32>
    %81 = arith.mulf %79, %80 : vector<8x8xf32>
    %cst_41 = arith.constant dense<0xFF800000> : vector<8xf32>
    %82 = vector.multi_reduction <maximumf>, %81, %cst_41 [1] : vector<8x8xf32> to vector<8xf32>
    %83 = vector.shape_cast %82 : vector<8xf32> to vector<8x1xf32>
    %84 = vector.broadcast %83 : vector<8x1xf32> to vector<8x8xf32>
    %85 = arith.subf %81, %84 : vector<8x8xf32>
    %86 = math.exp %85 : vector<8x8xf32>
    %cst_42 = arith.constant dense<0.000000e+00> : vector<8xf32>
    %87 = vector.multi_reduction <add>, %86, %cst_42 [1] : vector<8x8xf32> to vector<8xf32>
    %88 = vector.shape_cast %87 : vector<8xf32> to vector<8x1xf32>
    %89 = tpu.reciprocal %88 {approx = true} : vector<8x1xf32> -> vector<8x1xf32>
    %90 = vector.broadcast %89 : vector<8x1xf32> to vector<8x8xf32>
    %91 = arith.mulf %86, %90 : vector<8x8xf32>
    %92 = arith.truncf %91 : vector<8x8xf32> to vector<8x8xbf16>
    %93 = arith.truncf %76 : vector<8x16xf32> to vector<8x16xbf16>
    %cst_43 = arith.constant dense<0.000000e+00> : vector<8x16xf32>
    %94 = tpu.matmul %92, %93, %cst_43 {dimension_numbers = #tpu.dot_dimension_numbers<[1], [0], [0], [1], [0, 0, 1, 1], [], []>} : vector<8x8xbf16>, vector<8x16xbf16>, vector<8x16xf32> -> vector<8x16xf32>
    %95 = vector.extract_strided_slice %70 {offsets = [0, 16], sizes = [8, 16], strides = [1, 1]} : vector<8x32xf32> to vector<8x16xf32>
    %96 = vector.extract_strided_slice %73 {offsets = [0, 16], sizes = [8, 16], strides = [1, 1]} : vector<8x64xf32> to vector<8x16xf32>
    %97 = vector.extract_strided_slice %73 {offsets = [0, 48], sizes = [8, 16], strides = [1, 1]} : vector<8x64xf32> to vector<8x16xf32>
    %98 = arith.truncf %95 : vector<8x16xf32> to vector<8x16xbf16>
    %99 = arith.truncf %96 : vector<8x16xf32> to vector<8x16xbf16>
    %cst_44 = arith.constant dense<0.000000e+00> : vector<8x8xf32>
    %100 = tpu.matmul %98, %99, %cst_44 {dimension_numbers = #tpu.dot_dimension_numbers<[1], [1], [0], [0], [0, 0, 1, 0], [], []>} : vector<8x16xbf16>, vector<8x16xbf16>, vector<8x8xf32> -> vector<8x8xf32>
    %cst_45 = arith.constant 2.500000e-01 : f32
    %101 = vector.broadcast %cst_45 : f32 to vector<8x8xf32>
    %102 = arith.mulf %100, %101 : vector<8x8xf32>
    %cst_46 = arith.constant dense<0xFF800000> : vector<8xf32>
    %103 = vector.multi_reduction <maximumf>, %102, %cst_46 [1] : vector<8x8xf32> to vector<8xf32>
    %104 = vector.shape_cast %103 : vector<8xf32> to vector<8x1xf32>
    %105 = vector.broadcast %104 : vector<8x1xf32> to vector<8x8xf32>
    %106 = arith.subf %102, %105 : vector<8x8xf32>
    %107 = math.exp %106 : vector<8x8xf32>
    %cst_47 = arith.constant dense<0.000000e+00> : vector<8xf32>
    %108 = vector.multi_reduction <add>, %107, %cst_47 [1] : vector<8x8xf32> to vector<8xf32>
    %109 = vector.shape_cast %108 : vector<8xf32> to vector<8x1xf32>
    %110 = tpu.reciprocal %109 {approx = true} : vector<8x1xf32> -> vector<8x1xf32>
    %111 = vector.broadcast %110 : vector<8x1xf32> to vector<8x8xf32>
    %112 = arith.mulf %107, %111 : vector<8x8xf32>
    %113 = arith.truncf %112 : vector<8x8xf32> to vector<8x8xbf16>
    %114 = arith.truncf %97 : vector<8x16xf32> to vector<8x16xbf16>
    %cst_48 = arith.constant dense<0.000000e+00> : vector<8x16xf32>
    %115 = tpu.matmul %113, %114, %cst_48 {dimension_numbers = #tpu.dot_dimension_numbers<[1], [0], [0], [1], [0, 0, 1, 1], [], []>} : vector<8x8xbf16>, vector<8x16xbf16>, vector<8x16xf32> -> vector<8x16xf32>
    %116 = tpu.concatenate %94, %115 in 1 : vector<8x16xf32>, vector<8x16xf32> -> vector<8x32xf32>
    %c0_49 = arith.constant 0 : index
    %c0_50 = arith.constant 0 : index
    %117 = vector.load %arg18[%c0_49, %c0_50] : memref<32x32xbf16, #tpu.memory_space<vmem>>, vector<32x32xbf16>
    %118 = arith.truncf %116 : vector<8x32xf32> to vector<8x32xbf16>
    %cst_51 = arith.constant dense<0.000000e+00> : vector<8x32xf32>
    %119 = tpu.matmul %118, %117, %cst_51 {dimension_numbers = #tpu.dot_dimension_numbers<[1], [0], [0], [1], [0, 0, 1, 1], [], []>} : vector<8x32xbf16>, vector<32x32xbf16>, vector<8x32xf32> -> vector<8x32xf32>
    %120 = arith.addf %19, %119 : vector<8x32xf32>
    %c0_52 = arith.constant 0 : index
    %c0_53 = arith.constant 0 : index
    %121 = vector.load %arg17[%c0_52, %c0_53] : memref<1x32xf32, #tpu.memory_space<vmem>>, vector<1x32xf32>
    %122 = vector.broadcast %121 : vector<1x32xf32> to vector<8x32xf32>
    %123 = arith.addf %120, %122 : vector<8x32xf32>
    %c0_54 = arith.constant 0 : index
    %c0_55 = arith.constant 0 : index
    %124 = vector.load %arg16[%c0_54, %c0_55] : memref<1x32xf32, #tpu.memory_space<vmem>>, vector<1x32xf32>
    %c0_56 = arith.constant 0 : index
    %c0_57 = arith.constant 0 : index
    %125 = vector.load %arg15[%c0_56, %c0_57] : memref<1x32xf32, #tpu.memory_space<vmem>>, vector<1x32xf32>
    %cst_58 = arith.constant dense<0.000000e+00> : vector<8xf32>
    %126 = vector.multi_reduction <add>, %123, %cst_58 [1] : vector<8x32xf32> to vector<8xf32>
    %127 = vector.shape_cast %126 : vector<8xf32> to vector<8x1xf32>
    %cst_59 = arith.constant 3.200000e+01 : f32
    %128 = vector.broadcast %cst_59 : f32 to vector<8x1xf32>
    %129 = arith.divf %127, %128 : vector<8x1xf32>
    %130 = vector.broadcast %129 : vector<8x1xf32> to vector<8x32xf32>
    %131 = arith.subf %123, %130 : vector<8x32xf32>
    %132 = arith.mulf %131, %131 : vector<8x32xf32>
    %cst_60 = arith.constant dense<0.000000e+00> : vector<8xf32>
    %133 = vector.multi_reduction <add>, %132, %cst_60 [1] : vector<8x32xf32> to vector<8xf32>
    %134 = vector.shape_cast %133 : vector<8xf32> to vector<8x1xf32>
    %cst_61 = arith.constant 3.200000e+01 : f32
    %135 = vector.broadcast %cst_61 : f32 to vector<8x1xf32>
    %136 = arith.divf %134, %135 : vector<8x1xf32>
    %137 = vector.broadcast %129 : vector<8x1xf32> to vector<8x32xf32>
    %138 = arith.subf %123, %137 : vector<8x32xf32>
    %cst_62 = arith.constant 9.99999974E-6 : f32
    %139 = vector.broadcast %cst_62 : f32 to vector<8x1xf32>
    %140 = arith.addf %136, %139 : vector<8x1xf32>
    %141 = math.rsqrt %140 : vector<8x1xf32>
    %142 = vector.broadcast %141 : vector<8x1xf32> to vector<8x32xf32>
    %143 = arith.mulf %138, %142 : vector<8x32xf32>
    %144 = vector.broadcast %124 : vector<1x32xf32> to vector<8x32xf32>
    %145 = arith.mulf %143, %144 : vector<8x32xf32>
    %146 = vector.broadcast %125 : vector<1x32xf32> to vector<8x32xf32>
    %147 = arith.addf %145, %146 : vector<8x32xf32>
    %c0_63 = arith.constant 0 : index
    %c0_64 = arith.constant 0 : index
    %148 = vector.load %arg7[%c0_63, %c0_64] : memref<32x128xbf16, #tpu.memory_space<vmem>>, vector<32x128xbf16>
    %149 = arith.truncf %147 : vector<8x32xf32> to vector<8x32xbf16>
    %cst_65 = arith.constant dense<0.000000e+00> : vector<8x128xf32>
    %150 = tpu.matmul %149, %148, %cst_65 {dimension_numbers = #tpu.dot_dimension_numbers<[1], [0], [0], [1], [0, 0, 1, 1], [], []>} : vector<8x32xbf16>, vector<32x128xbf16>, vector<8x128xf32> -> vector<8x128xf32>
    %c0_66 = arith.constant 0 : index
    %c0_67 = arith.constant 0 : index
    %151 = vector.load %arg6[%c0_66, %c0_67] : memref<1x128xf32, #tpu.memory_space<vmem>>, vector<1x128xf32>
    %152 = vector.broadcast %151 : vector<1x128xf32> to vector<8x128xf32>
    %153 = arith.addf %150, %152 : vector<8x128xf32>
    %cst_68 = arith.constant 5.000000e-01 : f32
    %154 = vector.broadcast %cst_68 : f32 to vector<8x128xf32>
    %155 = arith.mulf %154, %153 : vector<8x128xf32>
    %cst_69 = arith.constant 0.707106769 : f32
    %156 = vector.broadcast %cst_69 : f32 to vector<8x128xf32>
    %157 = arith.mulf %153, %156 : vector<8x128xf32>
    %158 = math.erf %157 : vector<8x128xf32>
    %cst_70 = arith.constant 1.000000e+00 : f32
    %159 = vector.broadcast %cst_70 : f32 to vector<8x128xf32>
    %160 = arith.addf %159, %158 : vector<8x128xf32>
    %161 = arith.mulf %155, %160 : vector<8x128xf32>
    %c0_71 = arith.constant 0 : index
    %c0_72 = arith.constant 0 : index
    %162 = vector.load %arg9[%c0_71, %c0_72] : memref<128x32xbf16, #tpu.memory_space<vmem>>, vector<128x32xbf16>
    %163 = arith.truncf %161 : vector<8x128xf32> to vector<8x128xbf16>
    %cst_73 = arith.constant dense<0.000000e+00> : vector<8x32xf32>
    %164 = tpu.matmul %163, %162, %cst_73 {dimension_numbers = #tpu.dot_dimension_numbers<[1], [0], [0], [1], [0, 0, 1, 1], [], []>} : vector<8x128xbf16>, vector<128x32xbf16>, vector<8x32xf32> -> vector<8x32xf32>
    %165 = arith.addf %123, %164 : vector<8x32xf32>
    %c0_74 = arith.constant 0 : index
    %c0_75 = arith.constant 0 : index
    %166 = vector.load %arg8[%c0_74, %c0_75] : memref<1x32xf32, #tpu.memory_space<vmem>>, vector<1x32xf32>
    %167 = vector.broadcast %166 : vector<1x32xf32> to vector<8x32xf32>
    %168 = arith.addf %165, %167 : vector<8x32xf32>
    %c0_76 = arith.constant 0 : index
    %c0_77 = arith.constant 0 : index
    %169 = vector.load %arg28[%c0_76, %c0_77] : memref<1x32xf32, #tpu.memory_space<vmem>>, vector<1x32xf32>
    %c0_78 = arith.constant 0 : index
    %c0_79 = arith.constant 0 : index
    %170 = vector.load %arg27[%c0_78, %c0_79] : memref<1x32xf32, #tpu.memory_space<vmem>>, vector<1x32xf32>
    %cst_80 = arith.constant dense<0.000000e+00> : vector<8xf32>
    %171 = vector.multi_reduction <add>, %168, %cst_80 [1] : vector<8x32xf32> to vector<8xf32>
    %172 = vector.shape_cast %171 : vector<8xf32> to vector<8x1xf32>
    %cst_81 = arith.constant 3.200000e+01 : f32
    %173 = vector.broadcast %cst_81 : f32 to vector<8x1xf32>
    %174 = arith.divf %172, %173 : vector<8x1xf32>
    %175 = vector.broadcast %174 : vector<8x1xf32> to vector<8x32xf32>
    %176 = arith.subf %168, %175 : vector<8x32xf32>
    %177 = arith.mulf %176, %176 : vector<8x32xf32>
    %cst_82 = arith.constant dense<0.000000e+00> : vector<8xf32>
    %178 = vector.multi_reduction <add>, %177, %cst_82 [1] : vector<8x32xf32> to vector<8xf32>
    %179 = vector.shape_cast %178 : vector<8xf32> to vector<8x1xf32>
    %cst_83 = arith.constant 3.200000e+01 : f32
    %180 = vector.broadcast %cst_83 : f32 to vector<8x1xf32>
    %181 = arith.divf %179, %180 : vector<8x1xf32>
    %182 = vector.broadcast %174 : vector<8x1xf32> to vector<8x32xf32>
    %183 = arith.subf %168, %182 : vector<8x32xf32>
    %cst_84 = arith.constant 9.99999974E-6 : f32
    %184 = vector.broadcast %cst_84 : f32 to vector<8x1xf32>
    %185 = arith.addf %181, %184 : vector<8x1xf32>
    %186 = math.rsqrt %185 : vector<8x1xf32>
    %187 = vector.broadcast %186 : vector<8x1xf32> to vector<8x32xf32>
    %188 = arith.mulf %183, %187 : vector<8x32xf32>
    %189 = vector.broadcast %169 : vector<1x32xf32> to vector<8x32xf32>
    %190 = arith.mulf %188, %189 : vector<8x32xf32>
    %191 = vector.broadcast %170 : vector<1x32xf32> to vector<8x32xf32>
    %192 = arith.addf %190, %191 : vector<8x32xf32>
    %c0_85 = arith.constant 0 : index
    %c0_86 = arith.constant 0 : index
    %193 = vector.load %arg26[%c0_85, %c0_86] : memref<1x32xf32, #tpu.memory_space<vmem>>, vector<1x32xf32>
    %c0_87 = arith.constant 0 : index
    %c0_88 = arith.constant 0 : index
    %194 = vector.load %arg25[%c0_87, %c0_88] : memref<1x32xf32, #tpu.memory_space<vmem>>, vector<1x32xf32>
    %cst_89 = arith.constant dense<0.000000e+00> : vector<8xf32>
    %195 = vector.multi_reduction <add>, %18, %cst_89 [1] : vector<8x32xf32> to vector<8xf32>
    %196 = vector.shape_cast %195 : vector<8xf32> to vector<8x1xf32>
    %cst_90 = arith.constant 3.200000e+01 : f32
    %197 = vector.broadcast %cst_90 : f32 to vector<8x1xf32>
    %198 = arith.divf %196, %197 : vector<8x1xf32>
    %199 = vector.broadcast %198 : vector<8x1xf32> to vector<8x32xf32>
    %200 = arith.subf %18, %199 : vector<8x32xf32>
    %201 = arith.mulf %200, %200 : vector<8x32xf32>
    %cst_91 = arith.constant dense<0.000000e+00> : vector<8xf32>
    %202 = vector.multi_reduction <add>, %201, %cst_91 [1] : vector<8x32xf32> to vector<8xf32>
    %203 = vector.shape_cast %202 : vector<8xf32> to vector<8x1xf32>
    %cst_92 = arith.constant 3.200000e+01 : f32
    %204 = vector.broadcast %cst_92 : f32 to vector<8x1xf32>
    %205 = arith.divf %203, %204 : vector<8x1xf32>
    %206 = vector.broadcast %198 : vector<8x1xf32> to vector<8x32xf32>
    %207 = arith.subf %18, %206 : vector<8x32xf32>
    %cst_93 = arith.constant 9.99999974E-6 : f32
    %208 = vector.broadcast %cst_93 : f32 to vector<8x1xf32>
    %209 = arith.addf %205, %208 : vector<8x1xf32>
    %210 = math.rsqrt %209 : vector<8x1xf32>
    %211 = vector.broadcast %210 : vector<8x1xf32> to vector<8x32xf32>
    %212 = arith.mulf %207, %211 : vector<8x32xf32>
    %213 = vector.broadcast %193 : vector<1x32xf32> to vector<8x32xf32>
    %214 = arith.mulf %212, %213 : vector<8x32xf32>
    %215 = vector.broadcast %194 : vector<1x32xf32> to vector<8x32xf32>
    %216 = arith.addf %214, %215 : vector<8x32xf32>
    %c0_94 = arith.constant 0 : index
    %c0_95 = arith.constant 0 : index
    %217 = vector.load %arg33[%c0_94, %c0_95] : memref<32x32xbf16, #tpu.memory_space<vmem>>, vector<32x32xbf16>
    %218 = arith.truncf %192 : vector<8x32xf32> to vector<8x32xbf16>
    %cst_96 = arith.constant dense<0.000000e+00> : vector<8x32xf32>
    %219 = tpu.matmul %218, %217, %cst_96 {dimension_numbers = #tpu.dot_dimension_numbers<[1], [0], [0], [1], [0, 0, 1, 1], [], []>} : vector<8x32xbf16>, vector<32x32xbf16>, vector<8x32xf32> -> vector<8x32xf32>
    %c0_97 = arith.constant 0 : index
    %c0_98 = arith.constant 0 : index
    %220 = vector.load %arg24[%c0_97, %c0_98] : memref<32x64xbf16, #tpu.memory_space<vmem>>, vector<32x64xbf16>
    %221 = arith.truncf %216 : vector<8x32xf32> to vector<8x32xbf16>
    %cst_99 = arith.constant dense<0.000000e+00> : vector<8x64xf32>
    %222 = tpu.matmul %221, %220, %cst_99 {dimension_numbers = #tpu.dot_dimension_numbers<[1], [0], [0], [1], [0, 0, 1, 1], [], []>} : vector<8x32xbf16>, vector<32x64xbf16>, vector<8x64xf32> -> vector<8x64xf32>
    %223 = vector.extract_strided_slice %219 {offsets = [0, 0], sizes = [8, 16], strides = [1, 1]} : vector<8x32xf32> to vector<8x16xf32>
    %224 = vector.extract_strided_slice %222 {offsets = [0, 0], sizes = [8, 16], strides = [1, 1]} : vector<8x64xf32> to vector<8x16xf32>
    %225 = vector.extract_strided_slice %222 {offsets = [0, 32], sizes = [8, 16], strides = [1, 1]} : vector<8x64xf32> to vector<8x16xf32>
    %226 = arith.truncf %223 : vector<8x16xf32> to vector<8x16xbf16>
    %227 = arith.truncf %224 : vector<8x16xf32> to vector<8x16xbf16>
    %cst_100 = arith.constant dense<0.000000e+00> : vector<8x8xf32>
    %228 = tpu.matmul %226, %227, %cst_100 {dimension_numbers = #tpu.dot_dimension_numbers<[1], [1], [0], [0], [0, 0, 1, 0], [], []>} : vector<8x16xbf16>, vector<8x16xbf16>, vector<8x8xf32> -> vector<8x8xf32>
    %cst_101 = arith.constant 2.500000e-01 : f32
    %229 = vector.broadcast %cst_101 : f32 to vector<8x8xf32>
    %230 = arith.mulf %228, %229 : vector<8x8xf32>
    %cst_102 = arith.constant dense<0xFF800000> : vector<8xf32>
    %231 = vector.multi_reduction <maximumf>, %230, %cst_102 [1] : vector<8x8xf32> to vector<8xf32>
    %232 = vector.shape_cast %231 : vector<8xf32> to vector<8x1xf32>
    %233 = vector.broadcast %232 : vector<8x1xf32> to vector<8x8xf32>
    %234 = arith.subf %230, %233 : vector<8x8xf32>
    %235 = math.exp %234 : vector<8x8xf32>
    %cst_103 = arith.constant dense<0.000000e+00> : vector<8xf32>
    %236 = vector.multi_reduction <add>, %235, %cst_103 [1] : vector<8x8xf32> to vector<8xf32>
    %237 = vector.shape_cast %236 : vector<8xf32> to vector<8x1xf32>
    %238 = tpu.reciprocal %237 {approx = true} : vector<8x1xf32> -> vector<8x1xf32>
    %239 = vector.broadcast %238 : vector<8x1xf32> to vector<8x8xf32>
    %240 = arith.mulf %235, %239 : vector<8x8xf32>
    %241 = arith.truncf %240 : vector<8x8xf32> to vector<8x8xbf16>
    %242 = arith.truncf %225 : vector<8x16xf32> to vector<8x16xbf16>
    %cst_104 = arith.constant dense<0.000000e+00> : vector<8x16xf32>
    %243 = tpu.matmul %241, %242, %cst_104 {dimension_numbers = #tpu.dot_dimension_numbers<[1], [0], [0], [1], [0, 0, 1, 1], [], []>} : vector<8x8xbf16>, vector<8x16xbf16>, vector<8x16xf32> -> vector<8x16xf32>
    %244 = vector.extract_strided_slice %219 {offsets = [0, 16], sizes = [8, 16], strides = [1, 1]} : vector<8x32xf32> to vector<8x16xf32>
    %245 = vector.extract_strided_slice %222 {offsets = [0, 16], sizes = [8, 16], strides = [1, 1]} : vector<8x64xf32> to vector<8x16xf32>
    %246 = vector.extract_strided_slice %222 {offsets = [0, 48], sizes = [8, 16], strides = [1, 1]} : vector<8x64xf32> to vector<8x16xf32>
    %247 = arith.truncf %244 : vector<8x16xf32> to vector<8x16xbf16>
    %248 = arith.truncf %245 : vector<8x16xf32> to vector<8x16xbf16>
    %cst_105 = arith.constant dense<0.000000e+00> : vector<8x8xf32>
    %249 = tpu.matmul %247, %248, %cst_105 {dimension_numbers = #tpu.dot_dimension_numbers<[1], [1], [0], [0], [0, 0, 1, 0], [], []>} : vector<8x16xbf16>, vector<8x16xbf16>, vector<8x8xf32> -> vector<8x8xf32>
    %cst_106 = arith.constant 2.500000e-01 : f32
    %250 = vector.broadcast %cst_106 : f32 to vector<8x8xf32>
    %251 = arith.mulf %249, %250 : vector<8x8xf32>
    %cst_107 = arith.constant dense<0xFF800000> : vector<8xf32>
    %252 = vector.multi_reduction <maximumf>, %251, %cst_107 [1] : vector<8x8xf32> to vector<8xf32>
    %253 = vector.shape_cast %252 : vector<8xf32> to vector<8x1xf32>
    %254 = vector.broadcast %253 : vector<8x1xf32> to vector<8x8xf32>
    %255 = arith.subf %251, %254 : vector<8x8xf32>
    %256 = math.exp %255 : vector<8x8xf32>
    %cst_108 = arith.constant dense<0.000000e+00> : vector<8xf32>
    %257 = vector.multi_reduction <add>, %256, %cst_108 [1] : vector<8x8xf32> to vector<8xf32>
    %258 = vector.shape_cast %257 : vector<8xf32> to vector<8x1xf32>
    %259 = tpu.reciprocal %258 {approx = true} : vector<8x1xf32> -> vector<8x1xf32>
    %260 = vector.broadcast %259 : vector<8x1xf32> to vector<8x8xf32>
    %261 = arith.mulf %256, %260 : vector<8x8xf32>
    %262 = arith.truncf %261 : vector<8x8xf32> to vector<8x8xbf16>
    %263 = arith.truncf %246 : vector<8x16xf32> to vector<8x16xbf16>
    %cst_109 = arith.constant dense<0.000000e+00> : vector<8x16xf32>
    %264 = tpu.matmul %262, %263, %cst_109 {dimension_numbers = #tpu.dot_dimension_numbers<[1], [0], [0], [1], [0, 0, 1, 1], [], []>} : vector<8x8xbf16>, vector<8x16xbf16>, vector<8x16xf32> -> vector<8x16xf32>
    %265 = tpu.concatenate %243, %264 in 1 : vector<8x16xf32>, vector<8x16xf32> -> vector<8x32xf32>
    %c0_110 = arith.constant 0 : index
    %c0_111 = arith.constant 0 : index
    %266 = vector.load %arg32[%c0_110, %c0_111] : memref<32x32xbf16, #tpu.memory_space<vmem>>, vector<32x32xbf16>
    %267 = arith.truncf %265 : vector<8x32xf32> to vector<8x32xbf16>
    %cst_112 = arith.constant dense<0.000000e+00> : vector<8x32xf32>
    %268 = tpu.matmul %267, %266, %cst_112 {dimension_numbers = #tpu.dot_dimension_numbers<[1], [0], [0], [1], [0, 0, 1, 1], [], []>} : vector<8x32xbf16>, vector<32x32xbf16>, vector<8x32xf32> -> vector<8x32xf32>
    %269 = arith.addf %168, %268 : vector<8x32xf32>
    %c0_113 = arith.constant 0 : index
    %c0_114 = arith.constant 0 : index
    %270 = vector.load %arg31[%c0_113, %c0_114] : memref<1x32xf32, #tpu.memory_space<vmem>>, vector<1x32xf32>
    %271 = vector.broadcast %270 : vector<1x32xf32> to vector<8x32xf32>
    %272 = arith.addf %269, %271 : vector<8x32xf32>
    %c0_115 = arith.constant 0 : index
    %c0_116 = arith.constant 0 : index
    %273 = vector.load %arg30[%c0_115, %c0_116] : memref<1x32xf32, #tpu.memory_space<vmem>>, vector<1x32xf32>
    %c0_117 = arith.constant 0 : index
    %c0_118 = arith.constant 0 : index
    %274 = vector.load %arg29[%c0_117, %c0_118] : memref<1x32xf32, #tpu.memory_space<vmem>>, vector<1x32xf32>
    %cst_119 = arith.constant dense<0.000000e+00> : vector<8xf32>
    %275 = vector.multi_reduction <add>, %272, %cst_119 [1] : vector<8x32xf32> to vector<8xf32>
    %276 = vector.shape_cast %275 : vector<8xf32> to vector<8x1xf32>
    %cst_120 = arith.constant 3.200000e+01 : f32
    %277 = vector.broadcast %cst_120 : f32 to vector<8x1xf32>
    %278 = arith.divf %276, %277 : vector<8x1xf32>
    %279 = vector.broadcast %278 : vector<8x1xf32> to vector<8x32xf32>
    %280 = arith.subf %272, %279 : vector<8x32xf32>
    %281 = arith.mulf %280, %280 : vector<8x32xf32>
    %cst_121 = arith.constant dense<0.000000e+00> : vector<8xf32>
    %282 = vector.multi_reduction <add>, %281, %cst_121 [1] : vector<8x32xf32> to vector<8xf32>
    %283 = vector.shape_cast %282 : vector<8xf32> to vector<8x1xf32>
    %cst_122 = arith.constant 3.200000e+01 : f32
    %284 = vector.broadcast %cst_122 : f32 to vector<8x1xf32>
    %285 = arith.divf %283, %284 : vector<8x1xf32>
    %286 = vector.broadcast %278 : vector<8x1xf32> to vector<8x32xf32>
    %287 = arith.subf %272, %286 : vector<8x32xf32>
    %cst_123 = arith.constant 9.99999974E-6 : f32
    %288 = vector.broadcast %cst_123 : f32 to vector<8x1xf32>
    %289 = arith.addf %285, %288 : vector<8x1xf32>
    %290 = math.rsqrt %289 : vector<8x1xf32>
    %291 = vector.broadcast %290 : vector<8x1xf32> to vector<8x32xf32>
    %292 = arith.mulf %287, %291 : vector<8x32xf32>
    %293 = vector.broadcast %273 : vector<1x32xf32> to vector<8x32xf32>
    %294 = arith.mulf %292, %293 : vector<8x32xf32>
    %295 = vector.broadcast %274 : vector<1x32xf32> to vector<8x32xf32>
    %296 = arith.addf %294, %295 : vector<8x32xf32>
    %c0_124 = arith.constant 0 : index
    %c0_125 = arith.constant 0 : index
    %297 = vector.load %arg21[%c0_124, %c0_125] : memref<32x128xbf16, #tpu.memory_space<vmem>>, vector<32x128xbf16>
    %298 = arith.truncf %296 : vector<8x32xf32> to vector<8x32xbf16>
    %cst_126 = arith.constant dense<0.000000e+00> : vector<8x128xf32>
    %299 = tpu.matmul %298, %297, %cst_126 {dimension_numbers = #tpu.dot_dimension_numbers<[1], [0], [0], [1], [0, 0, 1, 1], [], []>} : vector<8x32xbf16>, vector<32x128xbf16>, vector<8x128xf32> -> vector<8x128xf32>
    %c0_127 = arith.constant 0 : index
    %c0_128 = arith.constant 0 : index
    %300 = vector.load %arg20[%c0_127, %c0_128] : memref<1x128xf32, #tpu.memory_space<vmem>>, vector<1x128xf32>
    %301 = vector.broadcast %300 : vector<1x128xf32> to vector<8x128xf32>
    %302 = arith.addf %299, %301 : vector<8x128xf32>
    %cst_129 = arith.constant 5.000000e-01 : f32
    %303 = vector.broadcast %cst_129 : f32 to vector<8x128xf32>
    %304 = arith.mulf %303, %302 : vector<8x128xf32>
    %cst_130 = arith.constant 0.707106769 : f32
    %305 = vector.broadcast %cst_130 : f32 to vector<8x128xf32>
    %306 = arith.mulf %302, %305 : vector<8x128xf32>
    %307 = math.erf %306 : vector<8x128xf32>
    %cst_131 = arith.constant 1.000000e+00 : f32
    %308 = vector.broadcast %cst_131 : f32 to vector<8x128xf32>
    %309 = arith.addf %308, %307 : vector<8x128xf32>
    %310 = arith.mulf %304, %309 : vector<8x128xf32>
    %c0_132 = arith.constant 0 : index
    %c0_133 = arith.constant 0 : index
    %311 = vector.load %arg23[%c0_132, %c0_133] : memref<128x32xbf16, #tpu.memory_space<vmem>>, vector<128x32xbf16>
    %312 = arith.truncf %310 : vector<8x128xf32> to vector<8x128xbf16>
    %cst_134 = arith.constant dense<0.000000e+00> : vector<8x32xf32>
    %313 = tpu.matmul %312, %311, %cst_134 {dimension_numbers = #tpu.dot_dimension_numbers<[1], [0], [0], [1], [0, 0, 1, 1], [], []>} : vector<8x128xbf16>, vector<128x32xbf16>, vector<8x32xf32> -> vector<8x32xf32>
    %314 = arith.addf %272, %313 : vector<8x32xf32>
    %c0_135 = arith.constant 0 : index
    %c0_136 = arith.constant 0 : index
    %315 = vector.load %arg22[%c0_135, %c0_136] : memref<1x32xf32, #tpu.memory_space<vmem>>, vector<1x32xf32>
    %316 = vector.broadcast %315 : vector<1x32xf32> to vector<8x32xf32>
    %317 = arith.addf %314, %316 : vector<8x32xf32>
    %c0_137 = arith.constant 0 : index
    %c0_138 = arith.constant 0 : index
    %318 = vector.load %arg35[%c0_137, %c0_138] : memref<1x32xf32, #tpu.memory_space<vmem>>, vector<1x32xf32>
    %c0_139 = arith.constant 0 : index
    %c0_140 = arith.constant 0 : index
    %319 = vector.load %arg34[%c0_139, %c0_140] : memref<1x32xf32, #tpu.memory_space<vmem>>, vector<1x32xf32>
    %cst_141 = arith.constant dense<0.000000e+00> : vector<8xf32>
    %320 = vector.multi_reduction <add>, %317, %cst_141 [1] : vector<8x32xf32> to vector<8xf32>
    %321 = vector.shape_cast %320 : vector<8xf32> to vector<8x1xf32>
    %cst_142 = arith.constant 3.200000e+01 : f32
    %322 = vector.broadcast %cst_142 : f32 to vector<8x1xf32>
    %323 = arith.divf %321, %322 : vector<8x1xf32>
    %324 = vector.broadcast %323 : vector<8x1xf32> to vector<8x32xf32>
    %325 = arith.subf %317, %324 : vector<8x32xf32>
    %326 = arith.mulf %325, %325 : vector<8x32xf32>
    %cst_143 = arith.constant dense<0.000000e+00> : vector<8xf32>
    %327 = vector.multi_reduction <add>, %326, %cst_143 [1] : vector<8x32xf32> to vector<8xf32>
    %328 = vector.shape_cast %327 : vector<8xf32> to vector<8x1xf32>
    %cst_144 = arith.constant 3.200000e+01 : f32
    %329 = vector.broadcast %cst_144 : f32 to vector<8x1xf32>
    %330 = arith.divf %328, %329 : vector<8x1xf32>
    %331 = vector.broadcast %323 : vector<8x1xf32> to vector<8x32xf32>
    %332 = arith.subf %317, %331 : vector<8x32xf32>
    %cst_145 = arith.constant 9.99999974E-6 : f32
    %333 = vector.broadcast %cst_145 : f32 to vector<8x1xf32>
    %334 = arith.addf %330, %333 : vector<8x1xf32>
    %335 = math.rsqrt %334 : vector<8x1xf32>
    %336 = vector.broadcast %335 : vector<8x1xf32> to vector<8x32xf32>
    %337 = arith.mulf %332, %336 : vector<8x32xf32>
    %338 = vector.broadcast %318 : vector<1x32xf32> to vector<8x32xf32>
    %339 = arith.mulf %337, %338 : vector<8x32xf32>
    %340 = vector.broadcast %319 : vector<1x32xf32> to vector<8x32xf32>
    %341 = arith.addf %339, %340 : vector<8x32xf32>
    %c0_146 = arith.constant 0 : index
    %c0_147 = arith.constant 0 : index
    %342 = vector.load %arg39[%c0_146, %c0_147] : memref<32x16xbf16, #tpu.memory_space<vmem>>, vector<32x16xbf16>
    %343 = arith.truncf %341 : vector<8x32xf32> to vector<8x32xbf16>
    %cst_148 = arith.constant dense<0.000000e+00> : vector<8x16xf32>
    %344 = tpu.matmul %343, %342, %cst_148 {dimension_numbers = #tpu.dot_dimension_numbers<[1], [0], [0], [1], [0, 0, 1, 1], [], []>} : vector<8x32xbf16>, vector<32x16xbf16>, vector<8x16xf32> -> vector<8x16xf32>
    %c0_149 = arith.constant 0 : index
    %c0_150 = arith.constant 0 : index
    %345 = vector.load %arg38[%c0_149, %c0_150] : memref<1x16xf32, #tpu.memory_space<vmem>>, vector<1x16xf32>
    %346 = vector.broadcast %345 : vector<1x16xf32> to vector<8x16xf32>
    %347 = arith.addf %344, %346 : vector<8x16xf32>
    %c0_151 = arith.constant 0 : index
    %c0_152 = arith.constant 0 : index
    %348 = vector.load %arg40[%c0_151, %c0_152] : memref<8x16xf32, #tpu.memory_space<vmem>>, vector<8x16xf32>
    tpu.vector_store %arg40[%c0_151, %c0_152], %347 {strides = array<i32>} : memref<8x16xf32, #tpu.memory_space<vmem>>, vector<8x16xf32>,
    return
  }
  func.func @transform_0(%arg0: i32) -> (i32, i32) {
    %c0_i32 = arith.constant 0 : i32
    %c0_i32_0 = arith.constant 0 : i32
    return %arg0, %c0_i32 : i32, i32
  }
  func.func @transform_1(%arg0: i32) -> (i32, i32) {
    %c0_i32 = arith.constant 0 : i32
    %c0_i32_0 = arith.constant 0 : i32
    return %arg0, %c0_i32 : i32, i32
  }
  func.func @transform_2(%arg0: i32) -> (i32, i32) {
    %c0_i32 = arith.constant 0 : i32
    %c0_i32_0 = arith.constant 0 : i32
    return %arg0, %c0_i32 : i32, i32
  }
  func.func @transform_3(%arg0: i32) -> (i32, i32) {
    %c0_i32 = arith.constant 0 : i32
    %c0_i32_0 = arith.constant 0 : i32
    %c0_i32_1 = arith.constant 0 : i32
    return %c0_i32, %c0_i32_0 : i32, i32
  }
  func.func @transform_4(%arg0: i32) -> (i32, i32) {
    %c0_i32 = arith.constant 0 : i32
    %c0_i32_0 = arith.constant 0 : i32
    %c0_i32_1 = arith.constant 0 : i32
    return %c0_i32, %c0_i32_0 : i32, i32
  }
  func.func @transform_5(%arg0: i32) -> (i32, i32) {
    %c0_i32 = arith.constant 0 : i32
    %c0_i32_0 = arith.constant 0 : i32
    %c0_i32_1 = arith.constant 0 : i32
    return %c0_i32, %c0_i32_0 : i32, i32
  }
  func.func @transform_6(%arg0: i32) -> (i32, i32) {
    %c0_i32 = arith.constant 0 : i32
    %c0_i32_0 = arith.constant 0 : i32
    %c0_i32_1 = arith.constant 0 : i32
    return %c0_i32, %c0_i32_0 : i32, i32
  }
  func.func @transform_7(%arg0: i32) -> (i32, i32) {
    %c0_i32 = arith.constant 0 : i32
    %c0_i32_0 = arith.constant 0 : i32
    %c0_i32_1 = arith.constant 0 : i32
    return %c0_i32, %c0_i32_0 : i32, i32
  }
  func.func @transform_8(%arg0: i32) -> (i32, i32) {
    %c0_i32 = arith.constant 0 : i32
    %c0_i32_0 = arith.constant 0 : i32
    %c0_i32_1 = arith.constant 0 : i32
    return %c0_i32, %c0_i32_0 : i32, i32
  }
  func.func @transform_9(%arg0: i32) -> (i32, i32) {
    %c0_i32 = arith.constant 0 : i32
    %c0_i32_0 = arith.constant 0 : i32
    %c0_i32_1 = arith.constant 0 : i32
    return %c0_i32, %c0_i32_0 : i32, i32
  }
  func.func @transform_10(%arg0: i32) -> (i32, i32) {
    %c0_i32 = arith.constant 0 : i32
    %c0_i32_0 = arith.constant 0 : i32
    %c0_i32_1 = arith.constant 0 : i32
    return %c0_i32, %c0_i32_0 : i32, i32
  }
  func.func @transform_11(%arg0: i32) -> (i32, i32) {
    %c0_i32 = arith.constant 0 : i32
    %c0_i32_0 = arith.constant 0 : i32
    %c0_i32_1 = arith.constant 0 : i32
    return %c0_i32, %c0_i32_0 : i32, i32
  }
  func.func @transform_12(%arg0: i32) -> (i32, i32) {
    %c0_i32 = arith.constant 0 : i32
    %c0_i32_0 = arith.constant 0 : i32
    %c0_i32_1 = arith.constant 0 : i32
    return %c0_i32, %c0_i32_0 : i32, i32
  }
  func.func @transform_13(%arg0: i32) -> (i32, i32) {
    %c0_i32 = arith.constant 0 : i32
    %c0_i32_0 = arith.constant 0 : i32
    %c0_i32_1 = arith.constant 0 : i32
    return %c0_i32, %c0_i32_0 : i32, i32
  }
  func.func @transform_14(%arg0: i32) -> (i32, i32) {
    %c0_i32 = arith.constant 0 : i32
    %c0_i32_0 = arith.constant 0 : i32
    %c0_i32_1 = arith.constant 0 : i32
    return %c0_i32, %c0_i32_0 : i32, i32
  }
  func.func @transform_15(%arg0: i32) -> (i32, i32) {
    %c0_i32 = arith.constant 0 : i32
    %c0_i32_0 = arith.constant 0 : i32
    %c0_i32_1 = arith.constant 0 : i32
    return %c0_i32, %c0_i32_0 : i32, i32
  }
  func.func @transform_16(%arg0: i32) -> (i32, i32) {
    %c0_i32 = arith.constant 0 : i32
    %c0_i32_0 = arith.constant 0 : i32
    %c0_i32_1 = arith.constant 0 : i32
    return %c0_i32, %c0_i32_0 : i32, i32
  }
  func.func @transform_17(%arg0: i32) -> (i32, i32) {
    %c0_i32 = arith.constant 0 : i32
    %c0_i32_0 = arith.constant 0 : i32
    %c0_i32_1 = arith.constant 0 : i32
    return %c0_i32, %c0_i32_0 : i32, i32
  }
  func.func @transform_18(%arg0: i32) -> (i32, i32) {
    %c0_i32 = arith.constant 0 : i32
    %c0_i32_0 = arith.constant 0 : i32
    %c0_i32_1 = arith.constant 0 : i32
    return %c0_i32, %c0_i32_0 : i32, i32
  }
  func.func @transform_19(%arg0: i32) -> (i32, i32) {
    %c0_i32 = arith.constant 0 : i32
    %c0_i32_0 = arith.constant 0 : i32
    %c0_i32_1 = arith.constant 0 : i32
    return %c0_i32, %c0_i32_0 : i32, i32
  }
  func.func @transform_20(%arg0: i32) -> (i32, i32) {
    %c0_i32 = arith.constant 0 : i32
    %c0_i32_0 = arith.constant 0 : i32
    %c0_i32_1 = arith.constant 0 : i32
    return %c0_i32, %c0_i32_0 : i32, i32
  }
  func.func @transform_21(%arg0: i32) -> (i32, i32) {
    %c0_i32 = arith.constant 0 : i32
    %c0_i32_0 = arith.constant 0 : i32
    %c0_i32_1 = arith.constant 0 : i32
    return %c0_i32, %c0_i32_0 : i32, i32
  }
  func.func @transform_22(%arg0: i32) -> (i32, i32) {
    %c0_i32 = arith.constant 0 : i32
    %c0_i32_0 = arith.constant 0 : i32
    %c0_i32_1 = arith.constant 0 : i32
    return %c0_i32, %c0_i32_0 : i32, i32
  }
  func.func @transform_23(%arg0: i32) -> (i32, i32) {
    %c0_i32 = arith.constant 0 : i32
    %c0_i32_0 = arith.constant 0 : i32
    %c0_i32_1 = arith.constant 0 : i32
    return %c0_i32, %c0_i32_0 : i32, i32
  }
  func.func @transform_24(%arg0: i32) -> (i32, i32) {
    %c0_i32 = arith.constant 0 : i32
    %c0_i32_0 = arith.constant 0 : i32
    %c0_i32_1 = arith.constant 0 : i32
    return %c0_i32, %c0_i32_0 : i32, i32
  }
  func.func @transform_25(%arg0: i32) -> (i32, i32) {
    %c0_i32 = arith.constant 0 : i32
    %c0_i32_0 = arith.constant 0 : i32
    %c0_i32_1 = arith.constant 0 : i32
    return %c0_i32, %c0_i32_0 : i32, i32
  }
  func.func @transform_26(%arg0: i32) -> (i32, i32) {
    %c0_i32 = arith.constant 0 : i32
    %c0_i32_0 = arith.constant 0 : i32
    %c0_i32_1 = arith.constant 0 : i32
    return %c0_i32, %c0_i32_0 : i32, i32
  }
  func.func @transform_27(%arg0: i32) -> (i32, i32) {
    %c0_i32 = arith.constant 0 : i32
    %c0_i32_0 = arith.constant 0 : i32
    %c0_i32_1 = arith.constant 0 : i32
    return %c0_i32, %c0_i32_0 : i32, i32
  }
  func.func @transform_28(%arg0: i32) -> (i32, i32) {
    %c0_i32 = arith.constant 0 : i32
    %c0_i32_0 = arith.constant 0 : i32
    %c0_i32_1 = arith.constant 0 : i32
    return %c0_i32, %c0_i32_0 : i32, i32
  }
  func.func @transform_29(%arg0: i32) -> (i32, i32) {
    %c0_i32 = arith.constant 0 : i32
    %c0_i32_0 = arith.constant 0 : i32
    %c0_i32_1 = arith.constant 0 : i32
    return %c0_i32, %c0_i32_0 : i32, i32
  }
  func.func @transform_30(%arg0: i32) -> (i32, i32) {
    %c0_i32 = arith.constant 0 : i32
    %c0_i32_0 = arith.constant 0 : i32
    %c0_i32_1 = arith.constant 0 : i32
    return %c0_i32, %c0_i32_0 : i32, i32
  }
  func.func @transform_31(%arg0: i32) -> (i32, i32) {
    %c0_i32 = arith.constant 0 : i32
    %c0_i32_0 = arith.constant 0 : i32
    %c0_i32_1 = arith.constant 0 : i32
    return %c0_i32, %c0_i32_0 : i32, i32
  }
  func.func @transform_32(%arg0: i32) -> (i32, i32) {
    %c0_i32 = arith.constant 0 : i32
    %c0_i32_0 = arith.constant 0 : i32
    %c0_i32_1 = arith.constant 0 : i32
    return %c0_i32, %c0_i32_0 : i32, i32
  }
  func.func @transform_33(%arg0: i32) -> (i32, i32) {
    %c0_i32 = arith.constant 0 : i32
    %c0_i32_0 = arith.constant 0 : i32
    %c0_i32_1 = arith.constant 0 : i32
    return %c0_i32, %c0_i32_0 : i32, i32
  }
  func.func @transform_34(%arg0: i32) -> (i32, i32) {
    %c0_i32 = arith.constant 0 : i32
    %c0_i32_0 = arith.constant 0 : i32
    %c0_i32_1 = arith.constant 0 : i32
    return %c0_i32, %c0_i32_0 : i32, i32
  }
  func.func @transform_35(%arg0: i32) -> (i32, i32) {
    %c0_i32 = arith.constant 0 : i32
    %c0_i32_0 = arith.constant 0 : i32
    %c0_i32_1 = arith.constant 0 : i32
    return %c0_i32, %c0_i32_0 : i32, i32
  }
  func.func @transform_36(%arg0: i32) -> (i32, i32) {
    %c0_i32 = arith.constant 0 : i32
    %c0_i32_0 = arith.constant 0 : i32
    %c0_i32_1 = arith.constant 0 : i32
    return %c0_i32, %c0_i32_0 : i32, i32
  }
  func.func @transform_37(%arg0: i32) -> (i32, i32) {
    %c0_i32 = arith.constant 0 : i32
    %c0_i32_0 = arith.constant 0 : i32
    %c0_i32_1 = arith.constant 0 : i32
    return %c0_i32, %c0_i32_0 : i32, i32
  }
  func.func @transform_38(%arg0: i32) -> (i32, i32) {
    %c0_i32 = arith.constant 0 : i32
    %c0_i32_0 = arith.constant 0 : i32
    %c0_i32_1 = arith.constant 0 : i32
    return %c0_i32, %c0_i32_0 : i32, i32
  }
  func.func @transform_39(%arg0: i32) -> (i32, i32) {
    %c0_i32 = arith.constant 0 : i32
    %c0_i32_0 = arith.constant 0 : i32
    return %arg0, %c0_i32 : i32, i32
  }
}

</mosaic_0001>

<bundles_post_ra>
// kernel: tpu_custom_call.1
= control target key start
LH: loop header
LB: loop body
LE: loop exit
PB: predicated region body
PF: predicated region fallthrough
CT: control target
= control target key end

     0   :  { %s3570_s6 = smov 1   ;;  %s3571_s10 = smov 2   ;;  %s4158_s0 = inlined_call_operand.smem [shape: u32[40], index: -1, kind: input, shape index: {}] }
   0x1   :  { %s3624_s5 = sld [smem:[%s4158_s0]]   ;;  %s3572_s14 = smov 3  }
   0x2   :  { %s3629_s9 = sld [smem:[%s4158_s0 + %s3570_s6]]   ;;  %s3573_s18 = smov 4  }
   0x3   :  { %s3634_s13 = sld [smem:[%s4158_s0 + %s3571_s10]]   ;;  %s3574_s22 = smov 5  }
   0x4   :  { %s3639_s17 = sld [smem:[%s4158_s0 + %s3572_s14]]   ;;  %s3575_s26 = smov 6  }
   0x5   :  { %s3644_s21 = sld [smem:[%s4158_s0 + %s3573_s18]]   ;;  %s3576_s30 = smov 7  }
   0x6   :  { %s3649_s25 = sld [smem:[%s4158_s0 + %s3574_s22]]   ;;  %s3577_s4 = smov 8  }
   0x7   :  { %4179 = sst [smem:[#allocation5_spill]] %s3624_s5  ;;  %s3578_s10 = smov 9  }
   0x8   :  { %4180 = sst [smem:[#allocation6_spill]] %s3629_s9  ;;  %s3579_s15 = smov 10  }
   0x9   :  { %s3654_s29 = sld [smem:[%s4158_s0 + %s3575_s26]]   ;;  %s3580_s20 = smov 11  }
   0xa   :  { %s3659_s3 = sld [smem:[%s4158_s0 + %s3576_s30]]   ;;  %s3581_s26 = smov 12  }
   0xb   :  { %s3664_s8 = sld [smem:[%s4158_s0 + %s3577_s4]]   ;;  %s3582_s1 = smov 13  }
   0xc   :  { %4181 = sst [smem:[#allocation7_spill]] %s3649_s25  ;;  %s3583_s7 = smov 14  }
   0xd   :  { %s3669_s14 = sld [smem:[%s4158_s0 + %s3578_s10]]   ;;  %s3585_s22 = smov 16  }
   0xe   :  { %s3674_s19 = sld [smem:[%s4158_s0 + %s3579_s15]]   ;;  %s3584_s15 = smov 15  }
   0xf   :  { %4182 = sst [smem:[#allocation8_spill]] %s3654_s29  ;;  %s3586_s28 = smov 17  }
  0x10   :  { %4183 = sst [smem:[#allocation9_spill]] %s3659_s3 }
  0x11   :  { %4184 = sst [smem:[#allocation10_spill]] %s3664_s8 }
  0x12   :  { %s3679_s24 = sld [smem:[%s4158_s0 + %s3580_s20]]  }
  0x13   :  { %s3684_s30 = sld [smem:[%s4158_s0 + %s3581_s26]]  }
  0x14   :  { %s3689_s6 = sld [smem:[%s4158_s0 + %s3582_s1]]  }
  0x15   :  { %s3694_s12 = sld [smem:[%s4158_s0 + %s3583_s7]]   ;;  %s3587_s7 = smov 18  }
  0x16   :  { %s3699_s20 = sld [smem:[%s4158_s0 + %s3584_s15]]   ;;  %s3588_s15 = smov 19  }
  0x17   :  { %s3704_s27 = sld [smem:[%s4158_s0 + %s3585_s22]]   ;;  %s3589_s22 = smov 20  }
  0x18   :  { %s3709_s4 = sld [smem:[%s4158_s0 + %s3586_s28]]   ;;  %s3590_s28 = smov 21  }
  0x19   :  { %s3714_s3 = sld [smem:[%s4158_s0 + %s3587_s7]]   ;;  %s3591_s7 = smov 22  }
  0x1a   :  { %4185 = sst [smem:[#allocation11_spill]] %s3689_s6 }
  0x1b   :  { %4186 = sst [smem:[#allocation12_spill]] %s3694_s12 }
  0x1c   :  { %4187 = sst [smem:[#allocation13_spill]] %s3699_s20 }
  0x1d   :  { %s3719_s25 = sld [smem:[%s4158_s0 + %s3588_s15]]   ;;  %s3592_s15 = smov 23  }
  0x1e   :  { %4188 = sst [smem:[#allocation14_spill]] %s3709_s4 }
  0x1f   :  { %4189 = sst [smem:[#allocation15_spill]] %s3714_s3 }
  0x20   :  { %s3724_s12 = sld [smem:[%s4158_s0 + %s3589_s22]]   ;;  %s3593_s22 = smov 24  }
  0x21   :  { %s3729_s20 = sld [smem:[%s4158_s0 + %s3590_s28]]   ;;  %s3594_s28 = smov 25  }
  0x22   :  { %s3734_s8 = sld [smem:[%s4158_s0 + %s3591_s7]]   ;;  %s3595_s7 = smov 26  }
  0x23   :  { %4190 = sst [smem:[#allocation16_spill]] %s3719_s25 }
  0x24   :  { %s3739_s25 = sld [smem:[%s4158_s0 + %s3592_s15]]   ;;  %s3596_s15 = smov 27  }
  0x26   :  { %4191 = sst [smem:[#allocation17_spill]] %s3724_s12 }
  0x27   :  { %4192 = sst [smem:[#allocation18_spill]] %s3729_s20 }
  0x28   :  { %4193 = sst [smem:[#allocation19_spill]] %s3734_s8 }
  0x29   :  { %s3744_s12 = sld [smem:[%s4158_s0 + %s3593_s22]]   ;;  %s3597_s22 = smov 28  }
  0x2a   :  { %4194 = sst [smem:[#allocation20_spill]] %s3739_s25 }
  0x2b   :  { %s3749_s20 = sld [smem:[%s4158_s0 + %s3594_s28]]   ;;  %s3598_s28 = smov 29  }
  0x2c   :  { %s3754_s8 = sld [smem:[%s4158_s0 + %s3595_s7]]   ;;  %s3599_s7 = smov 30  }
  0x2d   :  { %s3759_s25 = sld [smem:[%s4158_s0 + %s3596_s15]]   ;;  %s3600_s15 = smov 31  }
  0x2f   :  { %4195 = sst [smem:[#allocation21_spill]] %s3744_s12 }
  0x30   :  { %s3764_s12 = sld [smem:[%s4158_s0 + %s3597_s22]]   ;;  %s3601_s22 = smov 32  }
  0x31   :  { %4196 = sst [smem:[#allocation22_spill]] %s3749_s20 }
  0x32   :  { %4197 = sst [smem:[#allocation23_spill]] %s3754_s8 }
  0x33   :  { %4198 = sst [smem:[#allocation24_spill]] %s3759_s25 }
  0x34   :  { %s3769_s20 = sld [smem:[%s4158_s0 + %s3598_s28]]   ;;  %s3602_s28 = smov 33  }
  0x35   :  { %s3774_s8 = sld [smem:[%s4158_s0 + %s3599_s7]]   ;;  %s3603_s7 = smov 34  }
  0x36   :  { %4199 = sst [smem:[#allocation25_spill]] %s3764_s12 }
  0x37   :  { %s3779_s25 = sld [smem:[%s4158_s0 + %s3600_s15]]   ;;  %s3604_s15 = smov 35  }
  0x38   :  { %s3784_s12 = sld [smem:[%s4158_s0 + %s3601_s22]]   ;;  %s3605_s22 = smov 36  }
  0x3a   :  { %4200 = sst [smem:[#allocation26_spill]] %s3769_s20 }
  0x3b   :  { %4201 = sst [smem:[#allocation27_spill]] %s3774_s8 }
  0x3c   :  { %s3789_s20 = sld [smem:[%s4158_s0 + %s3602_s28]]   ;;  %s3606_s28 = smov 37  }
  0x3d   :  { %4202 = sst [smem:[#allocation28_spill]] %s3779_s25 }
  0x3e   :  { %4203 = sst [smem:[#allocation29_spill]] %s3784_s12 }
  0x3f   :  { %s3794_s8 = sld [smem:[%s4158_s0 + %s3603_s7]]   ;;  %s3607_s7 = smov 38  }
  0x40   :  { %s3799_s25 = sld [smem:[%s4158_s0 + %s3604_s15]]   ;;  %s3608_s15 = smov 39  }
  0x41   :  { %s3804_s12 = sld [smem:[%s4158_s0 + %s3605_s22]]  }
  0x42   :  { %4204 = sst [smem:[#allocation30_spill]] %s3789_s20 }
  0x43   :  { %s3809_s20 = sld [smem:[%s4158_s0 + %s3606_s28]]  }
  0x44   :  { %s3819_s29 = sld [smem:[%s4158_s0 + %s3608_s15]]  }
  0x45   :  { %4205 = sst [smem:[#allocation31_spill]] %s3794_s8 }
  0x46   :  { %s3814_s8 = sld [smem:[%s4158_s0 + %s3607_s7]]  }
  0x4c   :  { %4206 = sst [smem:[#allocation32_spill]] %s3814_s8 }
  0x4d   :  { %84 = vsyncpa [#allocation3], 0 }
  0x4e   :  { %86 = vsyncpa [#allocation3 + $0x1], 0  ;;  %s3821_s22 = smov 0   ;;  %s3823_s23 = smov 0  }
  0x4f   :  { %s3825_s26 = smov 0   ;;  %s3827_s28 = smov 0  }
  0x50 LB: > { %s4207_s8 = sld [smem:[#allocation32_spill]]  ;;  %s4208_s4 = sld [smem:[#allocation14_spill]]  ;;  %s3564_s26 = sphi %s3825_s26, %s4243_s26   ;;  %s3560_s23 = sphi %s3823_s23, %s4242_s23   ;;  %s3556_s22 = sphi %s3821_s22, %s4241_s22   ;;  %s3568_s28 = sphi %s3827_s28, %s4244_s28  }
  0x51   : > { %s4209_s3 = sld [smem:[#allocation15_spill]]  ;;  %s3842_s0 = sadd.s32 4294967295, %s3568_s28  }
  0x52   : > { %s3006_s1 = sadd.s32 4294967294, %s3568_s28   ;;  %s3846_s2 = sadd.s32 1, %s3568_s28  }
  0x53   : > { %s933_s7 = sadd.s32 1, %s3564_s26  ;;  %s930_s10 = ssub.s32 %s3568_s28, %s3846_s2 }
  0x54   : > { %p943_p0 = scmp.ne.s32.totalorder %s3564_s26, %s3560_s23  ;;  %p931_p1 = scmp.eq.s32.totalorder %s930_s10, 0 }
  0x55   : > { %p944_p2 = scmp.eq.s32.totalorder %s3842_s0, 1  ;;  %p949_p3 = scmp.ne.s32.totalorder %s3560_s23, %s3556_s22 }
  0x56   : > { %p950_p4 = scmp.eq.s32.totalorder %s3006_s1, 1  ;;  %p3009_p7 = scmp.ge.s32.totalorder %s3568_s28, 1 }
  0x57   : > { %s3857_s11 = scalar_select %p931_p1, %s3564_s26, %s933_s7  }
  0x58   : > { %p3859_p5 = por %p944_p2, %p943_p0  ;;  %p3863_p6 = por %p950_p4, %p949_p3 }
  0x59   : > { %p1097_p8 = scmp.lt.s32.totalorder %s3568_s28, 3 }
  0x5b   : > { %p1098_p9 = pnand %p3009_p7, %p1097_p8 }
  0x5c   : > { %s4212_s5 = sld [smem:[#allocation5_spill]] (!%p1098_p9)  ;;  %s4213_s9 = sld [smem:[#allocation6_spill]] (!%p1098_p9)  ;;  %v3435_v0 = vld [vmem:[%s3804_s12] sm:$0xff] (!%p1098_p9)   ;;  %v3609_v1 = vmov (!%p1098_p9), 0.0   ;;  %vm3610_vm0 = vmmov (!%p1098_p9), 0   ;;  %vm1230_vm1 = vcmask (!%p1098_p9), 130048  }
  0x5d   : > { %1101 = sbr.rel (%p1098_p9) target bundleno = 6074 (0x17ba), region = 176  ;;  %3169 = vmatprep.subr.bf16.mxu0 (!%p1098_p9), %v3609_v1  ;;  %p1200_p10 = scmp.lt.s32.totalorder (!%p1098_p9), %s3842_s0, 1  ;;  %3191 = vmatprep.subr.bf16.mxu1 (!%p1098_p9), %v3609_v1  ;;  %v3436_v3 = vld [vmem:[%s3644_s21 + $0x10] sm:$0xff] (!%p1098_p9)   ;;  %vm1297_vm2 = vcmask (!%p1098_p9), 261120   ;;  %v3437_v5 = vld [vmem:[%s3644_s21 + $0x18] sm:$0xff] (!%p1098_p9)   ;;  %v3438_v7 = vld [vmem:[%s3644_s21] sm:$0xff] (!%p1098_p9)  }
  0x5e   : > { %3170 = vmatpush3.bf16.msra.mxu0 (!%p1098_p9), %v3435_v0  ;;  %3171 = vmatprep.mubr.msk.bf16.mxu0 (!%p1098_p9), %vm3610_vm0, %v3609_v1  ;;  %v3439_v9 = vld [vmem:[%s3644_s21 + $0x8] sm:$0xff] (!%p1098_p9)   ;;  %v3014_v10 = vld [vmem:[%s3799_s25] ss:$0 sm:$0xff] (!%p1098_p9)  ;;  %s4214_s6 = sld [smem:[#allocation11_spill]] (!%p1098_p9)  ;;  %vm1633_vm3 = vcmask (!%p1098_p9), 64512   ;;  %vm1652_vm4 = vcmask (!%p1098_p9), 1043456  }
  0x5f   : > { %3175 = vmatprep.subr.bf16.mxu0 (!%p1098_p9), %v3609_v1  ;;  %3195 = vmatprep.mubr.msk.bf16.mxu1 (!%p1098_p9), %vm3610_vm0, %v3609_v1  ;;  %v3023_v22 = vld [vmem:[%s3639_s17] ss:$0 sm:$0xff] (!%p1098_p9)  ;;  %v3442_v43 = vld [vmem:[%s3669_s14 + $0x8] sm:$0xff] (!%p1098_p9)  }
  0x60   : > { %v3440_v41 = vld [vmem:[%s3669_s14] sm:$0xff] (!%p1098_p9)   ;;  %v3443_v44 = vld [vmem:[%s4209_s3 + $0x8] sm:$0xff] (!%p1098_p9)  }
  0x61   : > { %v3441_v42 = vld [vmem:[%s4209_s3] sm:$0xff] (!%p1098_p9)   ;;  %s4219_s3 = sld [smem:[#allocation7_spill]] (!%p1098_p9) }
  0x62   : > { %3192 = vmatpush3.bf16.msra.mxu1 (!%p1098_p9), %v3441_v42  ;;  %v3026_v52 = vld [vmem:[%s3679_s24] ss:$0 sm:$0xff] (!%p1098_p9) }
  0x63   : > { %3193 = vmatprep.subr.bf16.mxu1 (!%p1098_p9), %v3609_v1  ;;  %v3027_v54 = vld [vmem:[%s3674_s19] ss:$0 sm:$0xff] (!%p1098_p9) }
  0x64   : > { %s1201_s18 = scalar_select %p1200_p10, %s3842_s0, 1  ;;  %v3024_v57 = vld [vmem:[%s4214_s6] ss:$0 sm:$0xff] }
  0x65   : > { %v3025_v60 = vld [vmem:[%s3684_s30] ss:$0 sm:$0xff]  ;;  %s4226_s6 = sld [smem:[#allocation21_spill]] }
  0x66   : > { %s3879_s1 = sshll.u32 %s1201_s18, 3  ;;  %3194 = vmatpush3.bf16.msra.mxu1 %v3443_v44 }
  0x67   : > { %s1203_s7 = scalar_lea.vmem %s4212_s5, %s3879_s1  ;;  %s1207_s10 = scalar_lea.vmem %s4213_s9, %s3879_s1  ;;  %3207 = vmatprep.subr.bf16.mxu1 %v3609_v1 }
  0x68   : > { %v1213_v2 = vld [vmem:[%s1203_s7] sm:$0xff]  ;;  %s1211_s18 = scalar_lea.vmem %s3634_s13, %s3879_s1  ;;  %s4169_s1 = smov 112  }
  0x69   : > { %v1216_v4 = vpack.c.bf16 %v1213_v2, %v1213_v2  ;;  %v1283_v6 = vld [vmem:[%s1207_s10] sm:$0xff]  ;;  %s4168_s7 = smov 96   ;;  %s4166_s10 = smov 80  }
  0x6a   : > { %v1284_v8 = vpack.c.bf16 %v1283_v6, %v1283_v6  ;;  %v3906_v28 = vld [vmem:[%s1211_s18] sm:$0xff]  ;;  %s4167_s18 = smov 16   ;;  %s4225_s5 = sld [smem:[#allocation20_spill]] }
  0x6b   : > { %3172 = vmatmul.mubr.msk.bf16.vlgmr.msra.gmra.mrb[0].mxu0 %vm1230_vm1, %v1216_v4  ;;  %v1407_v30 = vsel %vm1297_vm2, %v3906_v28, 0.0 }
  0x6c   : > { %3176 = vmatpush3.bf16.msra.mxu0 %v3436_v3  ;;  %3179 = vmatprep.mubr.msk.bf16.mxu0 %vm3610_vm0, %v3609_v1 }
  0x6d   : > { %3177 = vmatprep.subr.bf16.mxu0 %v3609_v1 }
  0x70   : > { %3178 = vmatpush3.bf16.msra.mxu0 %v3437_v5 }
  0x71   : > { %3183 = vmatprep.subr.bf16.mxu0 %v3609_v1 }
  0x73   : > { %3180 = vmatmul.mubr.msk.bf16.vlgmr.msra.gmra.mrb[4].mxu0 %vm1297_vm2, %v1284_v8 }
  0x74   : > { %3184 = vmatpush3.bf16.msra.mxu0 %v3438_v7  ;;  %3187 = vmatprep.mubr.msk.bf16.mxu0 %vm3610_vm0, %v3609_v1 }
  0x75   : > { %3185 = vmatprep.subr.bf16.mxu0 %v3609_v1 }
  0x78   : > { %3186 = vmatpush3.bf16.msra.mxu0 %v3439_v9 }
  0x79   : > { %3199 = vmatprep.subr.bf16.mxu0 %v3609_v1 }
 0x13e   : > { %v1268_v11 = vpop.f32.mrb[0].mxu0 }
 0x13f   : > { %v1269_v12 = vadd.f32 %v3014_v10, %v1268_v11  ;;  %v3173_v13 = vpop.f32.mrb[1].mxu0 }
 0x140   : > { %v1271_v14 = vpop.f32.mrb[2].mxu0 }
 0x141   : > { %v1282_v15 = vpack.c.bf16 %v1269_v12, %v1269_v12  ;;  %v3174_v16 = vpop.f32.mrb[3].mxu0 }
 0x143   : > { %3188 = vmatmul.mubr.msk.bf16.vlgmr.msra.gmra.mrb[8].mxu0 %vm1297_vm2, %v1282_v15 }
 0x144   : > { %3203 = vmatprep.mubr.msk.bf16.mxu0 %vm3610_vm0, %v3609_v1  ;;  %3200 = vmatpush3.bf16.msra.mxu0 %v3440_v41 }
 0x145   : > { %3201 = vmatprep.subr.bf16.mxu0 %v3609_v1 }
 0x146   : > { %v1335_v17 = vpop.f32.mrb[4].mxu0 }
 0x147   : > { %v3181_v18 = vpop.f32.mrb[5].mxu0 }
 0x148   : > { %v1338_v19 = vpop.f32.mrb[6].mxu0  ;;  %3202 = vmatpush3.bf16.msra.mxu0 %v3442_v43 }
 0x149   : > { %v3182_v20 = vpop.f32.mrb[7].mxu0  ;;  %3213 = vmatprep.subr.bf16.mxu0 %v3609_v1 }
 0x216   : > { %v1390_v21 = vpop.f32.mrb[8].mxu0 }
 0x217   : > { %v1391_v23 = vadd.f32 %v1390_v21, %v1335_v17  ;;  %v3189_v24 = vpop.f32.mrb[9].mxu0 }
 0x218   : > { %v1393_v25 = vpop.f32.mrb[10].mxu0 }
 0x219   : > { %v3190_v26 = vpop.f32.mrb[11].mxu0  ;;  %v1403_v27 = vadd.f32 %v3023_v22, %v1391_v23 }
 0x21b   : > { %v1437_v29 = vsel %vm1297_vm2, %v1403_v27, 0.0 }
 0x21c   : > { %1438 = vadd.xlane.f32.xlu0 %v1437_v29 }
 0x220   : > { %1408 = vadd.xlane.f32.xlu0 %v1407_v30 }
 0x2a9   : > { %v1439_v31 = vpop.xlane.xlu0 %1438 }
 0x2aa   : > { %v1440_v32 = vmul.f32 0.03125, %v1439_v31 }
 0x2ac   : > { %v1441_v33 = vsub.f32 %v1403_v27, %v1440_v32 }
 0x2ad   : > { %v1409_v34 = vpop.xlane.xlu0 %1408 }
 0x2ae   : > { %v1411_v35 = vmul.f32 0.03125, %v1409_v34  ;;  %v1442_v36 = vmul.f32 %v1441_v33, %v1441_v33 }
 0x2b0   : > { %v1412_v37 = vsub.f32 %v3906_v28, %v1411_v35  ;;  %v1443_v38 = vsel %vm1297_vm2, %v1442_v36, 0.0 }
 0x2b1   : > { %1444 = vadd.xlane.f32.xlu1 %v1443_v38 }
 0x2b2   : > { %v1413_v39 = vmul.f32 %v1412_v37, %v1412_v37 }
 0x2b4   : > { %v1414_v40 = vsel %vm1297_vm2, %v1413_v39, 0.0 }
 0x2b5   : > { %1415 = vadd.xlane.f32.xlu1 %v1414_v40 }
 0x33e   : > { %v1445_v45 = vpop.xlane.xlu1 %1444 }
 0x33f   : > { %v1446_v46 = vmul.f32 0.03125, %v1445_v45 }
 0x341   : > { %v1447_v47 = vadd.f32 1e-05, %v1446_v46 }
 0x342   : > { %v1416_v48 = vpop.xlane.xlu1 %1415 }
 0x343   : > { %3474 = vrsqrt.f32 %v1447_v47  ;;  %v1417_v49 = vmul.f32 0.03125, %v1416_v48 }
 0x345   : > { %v1418_v50 = vadd.f32 1e-05, %v1417_v49 }
 0x347   : > { %3476 = vrsqrt.f32 %v1418_v50 }
 0x34d   : > { %v3475_v51 = vpop.eup %3474 }
 0x34e   : > { %v3923_v53 = vmul.f32 %v3475_v51, %v1441_v33  ;;  %v3444_v51 = vld [vmem:[%s4208_s4] sm:$0xff]  }
 0x350   : > { %v1456_v55 = vmul.f32 %v3026_v52, %v3923_v53 }
 0x351   : > { %v3477_v56 = vpop.eup %3476 }
 0x352   : > { %v1463_v58 = vadd.f32 %v3027_v54, %v1456_v55  ;;  %v1420_v59 = vmul.f32 %v3477_v56, %v1412_v37 }
 0x354   : > { %v1528_v61 = vpack.c.bf16 %v1463_v58, %v1463_v58  ;;  %v1427_v62 = vmul.f32 %v3024_v57, %v1420_v59  ;;  %v3445_v57 = vld [vmem:[%s4208_s4 + $0x8] sm:$0xff]   ;;  %s4224_s4 = sld [smem:[#allocation22_spill]] }
 0x356   : > { %3204 = vmatmul.mubr.msk.bf16.vlgmr.msra.gmra.mrb[12].mxu0 %vm1297_vm2, %v1528_v61  ;;  %v1434_v63 = vadd.f32 %v3025_v60, %v1427_v62 }
 0x357   : > { %3215 = vmatprep.mubr.msk.bf16.mxu0 %vm3610_vm0, %v3609_v1 }
 0x358   : > { %v1468_v0 = vpack.c.bf16 %v1434_v63, %v1434_v63 }
 0x35a   : > { %3196 = vmatmul.mubr.msk.bf16.vlgmr.msra.gmra.mrb[0].mxu1 %vm1297_vm2, %v1468_v0 }
 0x35b   : > { %3209 = vmatprep.mubr.msk.bf16.mxu1 %vm3610_vm0, %v3609_v1 }
 0x429   : > { %v1578_v2 = vpop.f32.mrb[12].mxu0 }
 0x42a   : > { %v1585_v3 = vpack.c.bf16 %v1578_v2, %v1578_v2  ;;  %v3205_v4 = vpop.f32.mrb[13].mxu0 }
 0x42b   : > { %v1581_v5 = vpop.f32.mrb[14].mxu0 }
 0x42c   : > { %1699 = vrot.lane.b32.xlu0 %v1585_v3, %s4169_s1  ;;  %v3206_v6 = vpop.f32.mrb[15].mxu0  ;;  %v1590_v7 = vsel %vm1230_vm1, %v1585_v3, 0 }
 0x42d   : > { %v1518_v8 = vpop.f32.mrb[0].mxu1  ;;  %3208 = vmatpush3.bf16.xpose.msra.mxu1 %v1590_v7 }
 0x42e   : > { %v1584_v9 = vpack.c.bf16 %v1518_v8, %v1518_v8  ;;  %v3197_v10 = vpop.f32.mrb[1].mxu1  ;;  %3219 = vmatprep.subr.bf16.mxu1 %v3609_v1 }
 0x42f   : > { %v1521_v11 = vpop.f32.mrb[2].mxu1 }
 0x430   : > { %1697 = vrot.lane.b32.xlu1 %v1584_v9, %s4169_s1  ;;  %v3198_v12 = vpop.f32.mrb[3].mxu1  ;;  %s4218_s1 = sld [smem:[#allocation12_spill]] }
 0x434   : > { %3210 = vmatmul.mubr.msk.bf16.vlgmr.msra.gmra.mrb[4].mxu1 %vm1230_vm1, %v1584_v9 }
 0x435   : > { %3221 = vmatprep.mubr.msk.bf16.mxu1 %vm3610_vm0, %v3609_v1 }
 0x49e   : > { %v1700_v13 = vpop.permute.xlu0 %1699 }
 0x49f   : > { %v1705_v14 = vsel %vm1230_vm1, %v1700_v13, 0 }
 0x4a0   : > { %3220 = vmatpush3.bf16.xpose.msra.mxu1 %v1705_v14 }
 0x4a1   : > { %3231 = vmatprep.subr.bf16.mxu1 %v3609_v1 }
 0x4a2   : > { %v1698_v15 = vpop.permute.xlu1 %1697 }
 0x4a7   : > { %3222 = vmatmul.mubr.msk.bf16.vlgmr.msra.gmra.mrb[8].mxu1 %vm1230_vm1, %v1698_v15 }
 0x4a8   : > { %3235 = vmatprep.mubr.msk.bf16.mxu1 %vm3610_vm0, %v3609_v1  ;;  %3232 = vmatpush3.bf16.msra.mxu1 %v3444_v51 }
 0x4a9   : > { %3233 = vmatprep.subr.bf16.mxu1 %v3609_v1 }
 0x4ac   : > { %3234 = vmatpush3.bf16.msra.mxu1 %v3445_v57 }
 0x4ad   : > { %3247 = vmatprep.subr.bf16.mxu1 %v3609_v1 }
 0x507   : > { %v1626_v16 = vpop.f32.mrb[4].mxu1 }
 0x508   : > { %v1632_v17 = vmul.f32 0.25, %v1626_v16  ;;  %v3211_v18 = vpop.f32.mrb[5].mxu1 }
 0x509   : > { %v1629_v19 = vpop.f32.mrb[6].mxu1 }
 0x50a   : > { %v3212_v20 = vpop.f32.mrb[7].mxu1  ;;  %v1634_v21 = vsel %vm1633_vm3, %v1632_v17, -inf }
 0x50b   : > { %1635 = vmax.xlane.f32.xlu1 %v1634_v21 }
 0x57a   : > { %v1741_v22 = vpop.f32.mrb[8].mxu1 }
 0x57b   : > { %v1747_v23 = vmul.f32 0.25, %v1741_v22  ;;  %v3223_v24 = vpop.f32.mrb[9].mxu1 }
 0x57c   : > { %v1744_v25 = vpop.f32.mrb[10].mxu1 }
 0x57d   : > { %v3224_v26 = vpop.f32.mrb[11].mxu1  ;;  %v1748_v27 = vsel %vm1633_vm3, %v1747_v23, -inf  ;;  %v3043_v25 = vld [vmem:[%s4218_s1] ss:$0 sm:$0xff]  ;;  %s4220_s1 = sld [smem:[#allocation9_spill]] }
 0x57e   : > { %1749 = vmax.xlane.f32.xlu0 %v1748_v27 }
 0x598   : > { %v1636_v29 = vpop.xlane.xlu1 %1635 }
 0x599   : > { %v1637_v30 = vsub.f32 %v1632_v17, %v1636_v29 }
 0x59b   : > { %v1638_v31 = vmul.f32 1.442695, %v1637_v30 }
 0x59d   : > { %3478 = vpow2.f32 %v1638_v31 }
 0x5a7   : > { %v3479_v32 = vpop.eup %3478 }
 0x5a8   : > { %v1640_v33 = vsel %vm1633_vm3, %v3479_v32, 0.0 }
 0x5a9   : > { %1641 = vadd.xlane.f32.xlu0 %v1640_v33 }
 0x5bf   : > { %1647 = vrot.lane.b32.xlu0 %v1585_v3, %s4168_s7  ;;  %s4217_s7 = sld [smem:[#allocation13_spill]] }
 0x60b   : > { %v1750_v34 = vpop.xlane.xlu0 %1749 }
 0x60c   : > { %v1751_v35 = vsub.f32 %v1747_v23, %v1750_v34  ;;  %v3042_v23 = vld [vmem:[%s4217_s7] ss:$0 sm:$0xff]  ;;  %s4221_s7 = sld [smem:[#allocation29_spill]] }
 0x60e   : > { %v1752_v36 = vmul.f32 1.442695, %v1751_v35  ;;  %v3044_v35 = vld [vmem:[%s4219_s3] ss:$0 sm:$0xff]  ;;  %s4222_s3 = sld [smem:[#allocation24_spill]] }
 0x610   : > { %3480 = vpow2.f32 %v1752_v36 }
 0x61a   : > { %v3481_v37 = vpop.eup %3480 }
 0x61b   : > { %v1754_v38 = vsel %vm1633_vm3, %v3481_v37, 0.0 }
 0x61c   : > { %1755 = vadd.xlane.f32.xlu1 %v1754_v38 }
 0x62d   : > { %1760 = vrot.lane.b32.xlu1 %v1585_v3, %s4166_s10  ;;  %s4215_s10 = sld [smem:[#allocation8_spill]]  ;;  %v3041_v3 = vld [vmem:[%s3704_s27] ss:$0 sm:$0xff] }
 0x633   : > { %v3447_v15 = vld [vmem:[%s4215_s10 + $0x8] sm:$0xff]  }
 0x636   : > { %v1642_v39 = vpop.xlane.xlu0 %1641 }
 0x637   : > { %3482 = vrcp.f32 %v1642_v39 }
 0x63a   : > { %v1648_v40 = vpop.permute.xlu0 %1647 }
 0x63b   : > { %v1654_v41 = vsel %vm1652_vm4, %v1648_v40, 0 }
 0x63c   : > { %3214 = vmatpush3.bf16.msra.mxu0 %v1654_v41 }
 0x63d   : > { %3225 = vmatprep.subr.bf16.mxu0 %v3609_v1 }
 0x641   : > { %v3483_v42 = vpop.eup %3482 }
 0x642   : > { %v1644_v43 = vmul.f32 %v3483_v42, %v3479_v32 }
 0x644   : > { %v1645_v44 = vpack.c.bf16 %v1644_v43, %v1644_v43 }
 0x646   : > { %3216 = vmatmul.mubr.msk.bf16.vlgmr.msra.gmra.mrb[16].mxu0 %vm1633_vm3, %v1645_v44 }
 0x647   : > { %3227 = vmatprep.mubr.msk.bf16.mxu0 %vm3610_vm0, %v3609_v1 }
 0x6a9   : > { %v1756_v45 = vpop.xlane.xlu1 %1755 }
 0x6aa   : > { %3484 = vrcp.f32 %v1756_v45 }
 0x6ad   : > { %v1761_v46 = vpop.permute.xlu1 %1760 }
 0x6ae   : > { %v1766_v47 = vsel %vm1652_vm4, %v1761_v46, 0 }
 0x6af   : > { %3226 = vmatpush3.bf16.msra.mxu0 %v1766_v47 }
 0x6b0   : > { %3239 = vmatprep.subr.bf16.mxu0 %v3609_v1 }
 0x6b4   : > { %v3485_v48 = vpop.eup %3484 }
 0x6b5   : > { %v1758_v49 = vmul.f32 %v3485_v48, %v3481_v37  ;;  %v3056_v48 = vld [vmem:[%s4220_s1] ss:$0 sm:$0xff]  ;;  %s4223_s1 = sld [smem:[#allocation23_spill]] }
 0x6b7   : > { %v1759_v50 = vpack.c.bf16 %v1758_v49, %v1758_v49 }
 0x6b9   : > { %3228 = vmatmul.mubr.msk.bf16.vlgmr.msra.gmra.mrb[20].mxu0 %vm1633_vm3, %v1759_v50 }
 0x6ba   : > { %3243 = vmatprep.mubr.msk.bf16.mxu0 %vm3610_vm0, %v3609_v1 }
 0x719   : > { %v1690_v52 = vpop.f32.mrb[16].mxu0 }
 0x71a   : > { %v3217_v54 = vpop.f32.mrb[17].mxu0 }
 0x71b   : > { %v1693_v55 = vpop.f32.mrb[18].mxu0 }
 0x71c   : > { %v3218_v56 = vpop.f32.mrb[19].mxu0 }
 0x78c   : > { %v1802_v58 = vpop.f32.mrb[20].mxu0 }
 0x78d   : > { %1809 = vrot.lane.b32.xlu1 %v1802_v58, %s4167_s18  ;;  %v3229_v59 = vpop.f32.mrb[21].mxu0  ;;  %s4216_s18 = sld [smem:[#allocation10_spill]] }
 0x78e   : > { %v1805_v60 = vpop.f32.mrb[22].mxu0 }
 0x78f   : > { %v3230_v61 = vpop.f32.mrb[23].mxu0 }
 0x790   : > { %v3456_v61 = vld [vmem:[%s4221_s7] sm:$0xff]  }
 0x793   : > { %v3448_v16 = vld [vmem:[%s4216_s18] sm:$0xff]   ;;  %v3449_v17 = vld [vmem:[%s4216_s18 + $0x8] sm:$0xff]   ;;  %v3450_v18 = vld [vmem:[%s4216_s18 + $0x10] sm:$0xff]  }
 0x794   : > { %v3451_v30 = vld [vmem:[%s4216_s18 + $0x18] sm:$0xff]   ;;  %v3452_v31 = vld [vmem:[%s4216_s18 + $0x20] sm:$0xff]   ;;  %v3453_v32 = vld [vmem:[%s4216_s18 + $0x28] sm:$0xff]  }
 0x795   : > { %v3454_v33 = vld [vmem:[%s4216_s18 + $0x30] sm:$0xff]   ;;  %v3455_v34 = vld [vmem:[%s4216_s18 + $0x38] sm:$0xff]  }
 0x7ff   : > { %v1810_v62 = vpop.permute.xlu1 %1809 }
 0x800   : > { %v1812_v63 = vsel %vm1230_vm1, %v1690_v52, %v1810_v62  ;;  %v3457_v62 = vld [vmem:[%s4221_s7 + $0x8] sm:$0xff]  }
 0x801   : > { %v1817_v0 = vpack.c.bf16 %v1812_v63, %v1812_v63 }
 0x803   : > { %3236 = vmatmul.mubr.msk.bf16.vlgmr.msra.gmra.mrb[12].mxu1 %vm1297_vm2, %v1817_v0 }
 0x804   : > { %3263 = vmatprep.mubr.msk.bf16.mxu1 %vm3610_vm0, %v3609_v1  ;;  %3248 = vmatpush3.bf16.msra.mxu1 %v3448_v16 }
 0x805   : > { %3249 = vmatprep.subr.bf16.mxu1 %v3609_v1 }
 0x808   : > { %3250 = vmatpush3.bf16.msra.mxu1 %v3449_v17 }
 0x809   : > { %3251 = vmatprep.subr.bf16.mxu1 %v3609_v1 }
 0x80c   : > { %3252 = vmatpush3.bf16.msra.mxu1 %v3450_v18 }
 0x80d   : > { %3253 = vmatprep.subr.bf16.mxu1 %v3609_v1 }
 0x810   : > { %3254 = vmatpush3.bf16.msra.mxu1 %v3451_v30 }
 0x811   : > { %3255 = vmatprep.subr.bf16.mxu1 %v3609_v1 }
 0x814   : > { %3256 = vmatpush3.bf16.msra.mxu1 %v3452_v31 }
 0x815   : > { %3257 = vmatprep.subr.bf16.mxu1 %v3609_v1 }
 0x818   : > { %3258 = vmatpush3.bf16.msra.mxu1 %v3453_v32 }
 0x819   : > { %3259 = vmatprep.subr.bf16.mxu1 %v3609_v1 }
 0x81c   : > { %3260 = vmatpush3.bf16.msra.mxu1 %v3454_v33 }
 0x81d   : > { %3261 = vmatprep.subr.bf16.mxu1 %v3609_v1 }
 0x820   : > { %3262 = vmatpush3.bf16.msra.mxu1 %v3455_v34 }
 0x821   : > { %3295 = vmatprep.subr.bf16.mxu1 %v3609_v1 }
 0x8d6   : > { %v1867_v2 = vpop.f32.mrb[12].mxu1 }
 0x8d7   : > { %v1873_v4 = vadd.f32 %v1867_v2, %v3906_v28  ;;  %v3237_v5 = vpop.f32.mrb[13].mxu1  ;;  %v3446_v28 = vld [vmem:[%s4215_s10] sm:$0xff]  }
 0x8d8   : > { %v1870_v6 = vpop.f32.mrb[14].mxu1  ;;  %3240 = vmatpush3.bf16.msra.mxu0 %v3446_v28 }
 0x8d9   : > { %v3974_v7 = vadd.f32 %v3041_v3, %v1873_v4  ;;  %v3238_v8 = vpop.f32.mrb[15].mxu1  ;;  %3241 = vmatprep.subr.bf16.mxu0 %v3609_v1  ;;  %v3057_v4 = vld [vmem:[%s4222_s3] ss:$0 sm:$0xff]  ;;  %s4229_s3 = smov 80  }
 0x8da   : > { %v3058_v6 = vld [vmem:[%s4223_s1] ss:$0 sm:$0xff]  ;;  %s4230_s1 = sld [smem:[#allocation28_spill]] }
 0x8db   : > { %v1884_v9 = vsel %vm1297_vm2, %v3974_v7, 0.0  ;;  %v3059_v8 = vld [vmem:[%s4224_s4] ss:$0 sm:$0xff]  ;;  %s4228_s4 = smov 96  }
 0x8dc   : > { %1885 = vadd.xlane.f32.xlu1 %v1884_v9  ;;  %3242 = vmatpush3.bf16.msra.mxu0 %v3447_v15 }
 0x8dd   : > { %3267 = vmatprep.subr.bf16.mxu0 %v3609_v1 }
 0x969   : > { %v1886_v10 = vpop.xlane.xlu1 %1885 }
 0x96a   : > { %v1887_v11 = vmul.f32 0.03125, %v1886_v10  ;;  %v3458_v10 = vld [vmem:[%s4225_s5] sm:$0xff]  }
 0x96c   : > { %v1888_v12 = vsub.f32 %v3974_v7, %v1887_v11 }
 0x96e   : > { %v1889_v13 = vmul.f32 %v1888_v12, %v1888_v12 }
 0x970   : > { %v1890_v14 = vsel %vm1297_vm2, %v1889_v13, 0.0  ;;  %v3060_v13 = vld [vmem:[%s4226_s6] ss:$0 sm:$0xff]  ;;  %s4227_s6 = smov 112  }
 0x971   : > { %1891 = vadd.xlane.f32.xlu0 %v1890_v14  ;;  %v3459_v14 = vld [vmem:[%s4225_s5 + $0x8] sm:$0xff]   ;;  %s3097_s5 = sshll.u32 %s3842_s0, 7  ;;  %s3615_s0 = smov [#allocation2]  }
 0x972   : > { %s4119_s9 = scalar_lea.hbm %s3819_s29, %s3097_s5 }
 0x9fe   : > { %v1892_v19 = vpop.xlane.xlu0 %1891 }
 0x9ff   : > { %v1893_v20 = vmul.f32 0.03125, %v1892_v19 }
 0xa01   : > { %v1894_v21 = vadd.f32 1e-05, %v1893_v20 }
 0xa03   : > { %3486 = vrsqrt.f32 %v1894_v21 }
 0xa0d   : > { %v3487_v22 = vpop.eup %3486 }
 0xa0e   : > { %v1896_v24 = vmul.f32 %v3487_v22, %v1888_v12  ;;  %v2134_v12 = vmul.f32 %v3059_v8, %v3923_v53  ;;  %v3461_v8 = vld [vmem:[%s4230_s1 + $0x8] sm:$0xff]  }
 0xa10   : > { %v1903_v26 = vmul.f32 %v3042_v23, %v1896_v24  ;;  %v2141_v28 = vadd.f32 %v3060_v13, %v2134_v12 }
 0xa12   : > { %v1910_v27 = vadd.f32 %v3043_v25, %v1903_v26  ;;  %v2206_v15 = vpack.c.bf16 %v2141_v28, %v2141_v28 }
 0xa14   : > { %v1915_v29 = vpack.c.bf16 %v1910_v27, %v1910_v27 }
 0xa16   : > { %3244 = vmatmul.mubr.msk.bf16.vlgmr.msra.gmra.mrb[24].mxu0 %vm1297_vm2, %v1915_v29 }
 0xa17   : > { %3271 = vmatprep.mubr.msk.bf16.mxu0 %vm3610_vm0, %v3609_v1  ;;  %3268 = vmatpush3.bf16.msra.mxu0 %v3456_v61 }
 0xa18   : > { %3269 = vmatprep.subr.bf16.mxu0 %v3609_v1 }
 0xa1b   : > { %3270 = vmatpush3.bf16.msra.mxu0 %v3457_v62 }
 0xa1c   : > { %3275 = vmatprep.subr.bf16.mxu0 %v3609_v1 }
 0xae9   : > { %v1972_v36 = vpop.f32.mrb[24].mxu0 }
 0xaea   : > { %v1973_v37 = vadd.f32 %v3044_v35, %v1972_v36  ;;  %v3245_v38 = vpop.f32.mrb[25].mxu0 }
 0xaeb   : > { %v1975_v39 = vpop.f32.mrb[26].mxu0 }
 0xaec   : > { %v1979_v40 = vmul.f32 0.70710677, %v1973_v37  ;;  %v3246_v41 = vpop.f32.mrb[27].mxu0  ;;  %v1978_v43 = vmul.f32 0.5, %v1973_v37 }
 0xaee   : > { %3488 = verf.f32 %v1979_v40 }
 0xaf8   : > { %v3489_v42 = vpop.eup %3488 }
 0xaf9   : > { %v1981_v44 = vadd.f32 1.0, %v3489_v42 }
 0xafb   : > { %v1982_v45 = vmul.f32 %v1981_v44, %v1978_v43 }
 0xafd   : > { %v1999_v46 = vpack.c.bf16 %v1982_v45, %v1982_v45 }
 0xaff   : > { %3264 = vmatmul.mubr.bf16.vlgmr.msra.gmra.mrb[16].mxu1 %v1999_v46 }
 0xb00   : > { %3297 = vmatprep.mubr.msk.bf16.mxu1 %vm3610_vm0, %v3609_v1 }
 0xbd2   : > { %v2082_v47 = vpop.f32.mrb[16].mxu1 }
 0xbd3   : > { %v2088_v49 = vadd.f32 %v2082_v47, %v3974_v7  ;;  %v3265_v50 = vpop.f32.mrb[17].mxu1 }
 0xbd4   : > { %v2085_v51 = vpop.f32.mrb[18].mxu1 }
 0xbd5   : > { %v4010_v52 = vadd.f32 %v3056_v48, %v2088_v49  ;;  %v3266_v54 = vpop.f32.mrb[19].mxu1 }
 0xbd7   : > { %v2099_v55 = vsel %vm1297_vm2, %v4010_v52, 0.0 }
 0xbd8   : > { %2100 = vadd.xlane.f32.xlu0 %v2099_v55 }
 0xc65   : > { %v2101_v56 = vpop.xlane.xlu0 %2100 }
 0xc66   : > { %v2102_v57 = vmul.f32 0.03125, %v2101_v56 }
 0xc68   : > { %v2103_v58 = vsub.f32 %v4010_v52, %v2102_v57 }
 0xc6a   : > { %v2104_v59 = vmul.f32 %v2103_v58, %v2103_v58 }
 0xc6c   : > { %v2105_v60 = vsel %vm1297_vm2, %v2104_v59, 0.0 }
 0xc6d   : > { %2106 = vadd.xlane.f32.xlu0 %v2105_v60 }
 0xcfa   : > { %v2107_v63 = vpop.xlane.xlu0 %2106 }
 0xcfb   : > { %v2108_v0 = vmul.f32 0.03125, %v2107_v63 }
 0xcfd   : > { %v2109_v2 = vadd.f32 1e-05, %v2108_v0 }
 0xcff   : > { %3490 = vrsqrt.f32 %v2109_v2 }
 0xd09   : > { %v3491_v3 = vpop.eup %3490 }
 0xd0a   : > { %v2111_v5 = vmul.f32 %v3491_v3, %v2103_v58  ;;  %v3460_v3 = vld [vmem:[%s4230_s1] sm:$0xff]   ;;  %s4236_s1 = sld [smem:[#allocation25_spill]] }
 0xd0c   : > { %v2118_v7 = vmul.f32 %v3057_v4, %v2111_v5 }
 0xd0e   : > { %v2125_v9 = vadd.f32 %v3058_v6, %v2118_v7 }
 0xd10   : > { %v2146_v11 = vpack.c.bf16 %v2125_v9, %v2125_v9 }
 0xd12   : > { %3272 = vmatmul.mubr.msk.bf16.vlgmr.msra.gmra.mrb[28].mxu0 %vm1297_vm2, %v2146_v11 }
 0xd13   : > { %3276 = vmatpush3.bf16.msra.mxu0 %v3458_v10  ;;  %3279 = vmatprep.mubr.msk.bf16.mxu0 %vm3610_vm0, %v3609_v1 }
 0xd14   : > { %3277 = vmatprep.subr.bf16.mxu0 %v3609_v1 }
 0xd17   : > { %3278 = vmatpush3.bf16.msra.mxu0 %v3459_v14 }
 0xd18   : > { %3283 = vmatprep.subr.bf16.mxu0 %v3609_v1 }
 0xd1a   : > { %3280 = vmatmul.mubr.msk.bf16.vlgmr.msra.gmra.mrb[32].mxu0 %vm1297_vm2, %v2206_v15 }
 0xd1b   : > { %3285 = vmatprep.mubr.msk.bf16.mxu0 %vm3610_vm0, %v3609_v1 }
 0xde5   : > { %v2196_v53 = vpop.f32.mrb[28].mxu0 }
 0xde6   : > { %v2262_v16 = vpack.c.bf16 %v2196_v53, %v2196_v53  ;;  %v3273_v17 = vpop.f32.mrb[29].mxu0 }
 0xde7   : > { %v2199_v18 = vpop.f32.mrb[30].mxu0 }
 0xde8   : > { %2373 = vrot.lane.b32.xlu0 %v2262_v16, %s4227_s6  ;;  %v3274_v19 = vpop.f32.mrb[31].mxu0 }
 0xded   : > { %v2256_v20 = vpop.f32.mrb[32].mxu0 }
 0xdee   : > { %v2263_v21 = vpack.c.bf16 %v2256_v20, %v2256_v20  ;;  %v3281_v22 = vpop.f32.mrb[33].mxu0 }
 0xdef   : > { %v2259_v23 = vpop.f32.mrb[34].mxu0 }
 0xdf0   : > { %2375 = vrot.lane.b32.xlu1 %v2263_v21, %s4227_s6  ;;  %v3282_v24 = vpop.f32.mrb[35].mxu0  ;;  %v2268_v25 = vsel %vm1230_vm1, %v2263_v21, 0  ;;  %s4231_s6 = sld [smem:[#allocation27_spill]] }
 0xdf1   : > { %3284 = vmatpush3.bf16.xpose.msra.mxu0 %v2268_v25 }
 0xdf2   : > { %3289 = vmatprep.subr.bf16.mxu0 %v3609_v1 }
 0xdf6   : > { %v3074_v53 = vld [vmem:[%s4231_s6] ss:$0 sm:$0xff]  ;;  %s4235_s6 = sld [smem:[#allocation26_spill]] }
 0xdf8   : > { %3286 = vmatmul.mubr.msk.bf16.vlgmr.msra.gmra.mrb[36].mxu0 %vm1230_vm1, %v2262_v16 }
 0xdf9   : > { %3291 = vmatprep.mubr.msk.bf16.mxu0 %vm3610_vm0, %v3609_v1 }
 0xe5a   : > { %v2374_v29 = vpop.permute.xlu0 %2373 }
 0xe62   : > { %v2376_v26 = vpop.permute.xlu1 %2375 }
 0xe63   : > { %v2381_v27 = vsel %vm1230_vm1, %v2376_v26, 0 }
 0xe64   : > { %3296 = vmatpush3.bf16.xpose.msra.mxu1 %v2381_v27 }
 0xe65   : > { %3307 = vmatprep.subr.bf16.mxu1 %v3609_v1 }
 0xe6b   : > { %3298 = vmatmul.mubr.msk.bf16.vlgmr.msra.gmra.mrb[20].mxu1 %vm1230_vm1, %v2374_v29 }
 0xe6c   : > { %3311 = vmatprep.mubr.msk.bf16.mxu1 %vm3610_vm0, %v3609_v1  ;;  %3308 = vmatpush3.bf16.msra.mxu1 %v3460_v3 }
 0xe6d   : > { %3309 = vmatprep.subr.bf16.mxu1 %v3609_v1 }
 0xe70   : > { %3310 = vmatpush3.bf16.msra.mxu1 %v3461_v8 }
 0xe71   : > { %3323 = vmatprep.subr.bf16.mxu1 %v3609_v1 }
 0xecb   : > { %v2304_v30 = vpop.f32.mrb[36].mxu0 }
 0xecc   : > { %v2310_v31 = vmul.f32 0.25, %v2304_v30  ;;  %v3287_v32 = vpop.f32.mrb[37].mxu0 }
 0xecd   : > { %v2307_v33 = vpop.f32.mrb[38].mxu0 }
 0xece   : > { %v3288_v34 = vpop.f32.mrb[39].mxu0  ;;  %v2311_v35 = vsel %vm1633_vm3, %v2310_v31, -inf }
 0xecf   : > { %2312 = vmax.xlane.f32.xlu1 %v2311_v35 }
 0xf3e   : > { %v2417_v36 = vpop.f32.mrb[20].mxu1 }
 0xf3f   : > { %v2423_v37 = vmul.f32 0.25, %v2417_v36  ;;  %v3299_v38 = vpop.f32.mrb[21].mxu1  ;;  %v3075_v36 = vld [vmem:[%s4235_s6] ss:$0 sm:$0xff]  ;;  %s4240_s6 = sld [smem:[#allocation30_spill]] }
 0xf40   : > { %v2420_v39 = vpop.f32.mrb[22].mxu1  ;;  %v3076_v38 = vld [vmem:[%s4236_s1] ss:$0 sm:$0xff]  ;;  %s4238_s1 = sld [smem:[#allocation18_spill]] }
 0xf41   : > { %v3300_v40 = vpop.f32.mrb[23].mxu1  ;;  %v2424_v41 = vsel %vm1633_vm3, %v2423_v37, -inf }
 0xf42   : > { %2425 = vmax.xlane.f32.xlu0 %v2424_v41 }
 0xf5c   : > { %v2313_v42 = vpop.xlane.xlu1 %2312 }
 0xf5d   : > { %v2314_v43 = vsub.f32 %v2310_v31, %v2313_v42 }
 0xf5f   : > { %v2315_v44 = vmul.f32 1.442695, %v2314_v43 }
 0xf61   : > { %3492 = vpow2.f32 %v2315_v44 }
 0xf6b   : > { %v3493_v45 = vpop.eup %3492 }
 0xf6c   : > { %v2317_v46 = vsel %vm1633_vm3, %v3493_v45, 0.0 }
 0xf6d   : > { %2318 = vadd.xlane.f32.xlu1 %v2317_v46 }
 0xf7e   : > { %2324 = vrot.lane.b32.xlu1 %v2263_v21, %s4228_s4  ;;  %s4232_s4 = smov 16  }
 0xfcf   : > { %v2426_v47 = vpop.xlane.xlu0 %2425 }
 0xfd0   : > { %v2427_v48 = vsub.f32 %v2423_v37, %v2426_v47 }
 0xfd2   : > { %v2428_v49 = vmul.f32 1.442695, %v2427_v48 }
 0xfd4   : > { %3494 = vpow2.f32 %v2428_v49 }
 0xfde   : > { %v3495_v50 = vpop.eup %3494 }
 0xfdf   : > { %v2430_v51 = vsel %vm1633_vm3, %v3495_v50, 0.0 }
 0xfe0   : > { %2431 = vadd.xlane.f32.xlu0 %v2430_v51 }
 0xff6   : > { %2436 = vrot.lane.b32.xlu0 %v2263_v21, %s4229_s3  ;;  %s4233_s3 = sld [smem:[#allocation17_spill]] }
 0xffa   : > { %v2319_v54 = vpop.xlane.xlu1 %2318 }
 0xffb   : > { %3496 = vrcp.f32 %v2319_v54 }
 0xffc   : > { %v3463_v27 = vld [vmem:[%s4233_s3 + $0x8] sm:$0xff]  }
 0xffe   : > { %v2325_v55 = vpop.permute.xlu1 %2324 }
 0xfff   : > { %v2330_v56 = vsel %vm1652_vm4, %v2325_v55, 0 }
0x1000   : > { %3290 = vmatpush3.bf16.msra.mxu0 %v2330_v56 }
0x1001   : > { %3301 = vmatprep.subr.bf16.mxu0 %v3609_v1 }
0x1005   : > { %v3497_v57 = vpop.eup %3496 }
0x1006   : > { %v2321_v58 = vmul.f32 %v3497_v57, %v3493_v45 }
0x1008   : > { %v2322_v59 = vpack.c.bf16 %v2321_v58, %v2321_v58 }
0x100a   : > { %3292 = vmatmul.mubr.msk.bf16.vlgmr.msra.gmra.mrb[40].mxu0 %vm1633_vm3, %v2322_v59 }
0x100b   : > { %3303 = vmatprep.mubr.msk.bf16.mxu0 %vm3610_vm0, %v3609_v1 }
0x106d   : > { %v2432_v60 = vpop.xlane.xlu0 %2431 }
0x106e   : > { %3498 = vrcp.f32 %v2432_v60 }
0x1071   : > { %v2437_v61 = vpop.permute.xlu0 %2436 }
0x1072   : > { %v2442_v62 = vsel %vm1652_vm4, %v2437_v61, 0 }
0x1073   : > { %3302 = vmatpush3.bf16.msra.mxu0 %v2442_v62  ;;  %v3089_v62 = vld [vmem:[%s4238_s1] ss:$0 sm:$0xff]  ;;  %s1197_s1 = sand.u32 1, %s3560_s23  }
0x1074   : > { %3315 = vmatprep.subr.bf16.mxu0 %v3609_v1 }
0x1078   : > { %v3499_v63 = vpop.eup %3498 }
0x1079   : > { %v2434_v0 = vmul.f32 %v3499_v63, %v3495_v50 }
0x107b   : > { %v2435_v2 = vpack.c.bf16 %v2434_v0, %v2434_v0 }
0x107d   : > { %3304 = vmatmul.mubr.msk.bf16.vlgmr.msra.gmra.mrb[44].mxu0 %vm1633_vm3, %v2435_v2 }
0x107e   : > { %3319 = vmatprep.mubr.msk.bf16.mxu0 %vm3610_vm0, %v3609_v1 }
0x10dd   : > { %v2366_v4 = vpop.f32.mrb[40].mxu0 }
0x10de   : > { %v3293_v5 = vpop.f32.mrb[41].mxu0 }
0x10df   : > { %v2369_v6 = vpop.f32.mrb[42].mxu0 }
0x10e0   : > { %v3294_v7 = vpop.f32.mrb[43].mxu0 }
0x1150   : > { %v2478_v9 = vpop.f32.mrb[44].mxu0 }
0x1151   : > { %2485 = vrot.lane.b32.xlu1 %v2478_v9, %s4232_s4  ;;  %v3305_v10 = vpop.f32.mrb[45].mxu0  ;;  %s4234_s4 = sld [smem:[#allocation19_spill]] }
0x1152   : > { %v2481_v11 = vpop.f32.mrb[46].mxu0 }
0x1153   : > { %v3306_v12 = vpop.f32.mrb[47].mxu0  ;;  %v3472_v11 = vld [vmem:[%s4207_s8] sm:$0xff]  }
0x1154   : > { %v3473_v12 = vld [vmem:[%s4207_s8 + $0x8] sm:$0xff]  }
0x1157   : > { %v3464_v29 = vld [vmem:[%s4234_s4] sm:$0xff]   ;;  %v3465_v30 = vld [vmem:[%s4234_s4 + $0x8] sm:$0xff]   ;;  %v3466_v31 = vld [vmem:[%s4234_s4 + $0x10] sm:$0xff]  }
0x1158   : > { %v3467_v42 = vld [vmem:[%s4234_s4 + $0x18] sm:$0xff]   ;;  %v3468_v43 = vld [vmem:[%s4234_s4 + $0x20] sm:$0xff]   ;;  %v3469_v44 = vld [vmem:[%s4234_s4 + $0x28] sm:$0xff]  }
0x1159   : > { %v3470_v45 = vld [vmem:[%s4234_s4 + $0x30] sm:$0xff]   ;;  %v3471_v46 = vld [vmem:[%s4234_s4 + $0x38] sm:$0xff]   ;;  %s3010_s4 = sshll.u32 %s1197_s1, 3 }
0x115a   : > { %s1199_s7 = scalar_lea.vmem [#allocation2], %s3010_s4  ;;  %s3510_s4 = sshll.u32 %s3615_s0, 4  ;;  %s3511_s4 = int_to_ptr.vmem [resolvable:$false] %s3510_s4 }
0x115b   : > { %s2884_s8 = sshll.u32 %s1199_s7, 4  ;;  %s3512_s5 = scalar_lea.vmem %s3511_s4, 256  ;;  %s4121_s8 = int_to_ptr.vmem [resolvable:$true] %s2884_s8 }
0x115c   : > { %p3513_p0 = scmp.lt.s32.totalorder %s4121_s8, %s3511_s4 }
0x11c3   : > { %v2486_v13 = vpop.permute.xlu1 %2485 }
0x11c4   : > { %v2488_v14 = vsel %vm1230_vm1, %v2366_v4, %v2486_v13 }
0x11c5   : > { %v2493_v28 = vpack.c.bf16 %v2488_v14, %v2488_v14 }
0x11c7   : > { %3312 = vmatmul.mubr.msk.bf16.vlgmr.msra.gmra.mrb[24].mxu1 %vm1297_vm2, %v2493_v28 }
0x11c8   : > { %3339 = vmatprep.mubr.msk.bf16.mxu1 %vm3610_vm0, %v3609_v1  ;;  %3324 = vmatpush3.bf16.msra.mxu1 %v3464_v29 }
0x11c9   : > { %3325 = vmatprep.subr.bf16.mxu1 %v3609_v1 }
0x11cc   : > { %3326 = vmatpush3.bf16.msra.mxu1 %v3465_v30 }
0x11cd   : > { %3327 = vmatprep.subr.bf16.mxu1 %v3609_v1 }
0x11d0   : > { %3328 = vmatpush3.bf16.msra.mxu1 %v3466_v31 }
0x11d1   : > { %3329 = vmatprep.subr.bf16.mxu1 %v3609_v1 }
0x11d4   : > { %3330 = vmatpush3.bf16.msra.mxu1 %v3467_v42 }
0x11d5   : > { %3331 = vmatprep.subr.bf16.mxu1 %v3609_v1 }
0x11d8   : > { %3332 = vmatpush3.bf16.msra.mxu1 %v3468_v43 }
0x11d9   : > { %3333 = vmatprep.subr.bf16.mxu1 %v3609_v1 }
0x11dc   : > { %3334 = vmatpush3.bf16.msra.mxu1 %v3469_v44 }
0x11dd   : > { %3335 = vmatprep.subr.bf16.mxu1 %v3609_v1 }
0x11e0   : > { %3336 = vmatpush3.bf16.msra.mxu1 %v3470_v45 }
0x11e1   : > { %3337 = vmatprep.subr.bf16.mxu1 %v3609_v1 }
0x11e4   : > { %3338 = vmatpush3.bf16.msra.mxu1 %v3471_v46 }
0x129a   : > { %v2543_v15 = vpop.f32.mrb[24].mxu1 }
0x129b   : > { %v2549_v16 = vadd.f32 %v2543_v15, %v4010_v52  ;;  %v3313_v17 = vpop.f32.mrb[25].mxu1  ;;  %v3462_v52 = vld [vmem:[%s4233_s3] sm:$0xff]   ;;  %s4237_s3 = sld [smem:[#allocation16_spill]] }
0x129c   : > { %v2546_v18 = vpop.f32.mrb[26].mxu1  ;;  %3316 = vmatpush3.bf16.msra.mxu0 %v3462_v52  ;;  %v3091_v17 = vld [vmem:[%s4240_s6] ss:$0 sm:$0xff]  ;;  %s3506_s6 = scalar_lea.vmem %s4121_s8, 128 }
0x129d   : > { %v4074_v19 = vadd.f32 %v3074_v53, %v2549_v16  ;;  %v3314_v20 = vpop.f32.mrb[27].mxu1  ;;  %3317 = vmatprep.subr.bf16.mxu0 %v3609_v1  ;;  %p3507_p11 = scmp.ne.s32.totalorder %s4121_s8, %s3506_s6  ;;  %p3514_p1 = scmp.lt.s32.totalorder %s3512_s5, %s3506_s6 }
0x129f   : > { %v2560_v21 = vsel %vm1297_vm2, %v4074_v19, 0.0  ;;  %p3508_p12 = pnand %p3507_p11, %p3859_p5  ;;  %p3515_p2 = por %p3514_p1, %p3513_p0 }
0x12a0   : > { %2561 = vadd.xlane.f32.xlu1 %v2560_v21  ;;  %3318 = vmatpush3.bf16.msra.mxu0 %v3463_v27 }
0x12a1   : > { %3343 = vmatprep.subr.bf16.mxu0 %v3609_v1  ;;  %v3077_v47 = vld [vmem:[%s4237_s3] ss:$0 sm:$0xff]  ;;  %s4239_s3 = sld [smem:[#allocation31_spill]]  ;;  %p3509_p13 = pneg %p3508_p12 }
0x12a3   : > { %p3516_p3 = pnand %p3515_p2, %p3509_p13 }
0x12a7   : > { %v3090_v53 = vld [vmem:[%s4239_s3] ss:$0 sm:$0xff]  ;;  %s2871_s3 = scalar_lea.sflag [#allocation3], %s1197_s1 }
0x132d   : > { %v2562_v22 = vpop.xlane.xlu1 %2561 }
0x132e   : > { %v2563_v23 = vmul.f32 0.03125, %v2562_v22 }
0x1330   : > { %v2564_v24 = vsub.f32 %v4074_v19, %v2563_v23 }
0x1332   : > { %v2565_v25 = vmul.f32 %v2564_v24, %v2564_v24 }
0x1334   : > { %v2566_v26 = vsel %vm1297_vm2, %v2565_v25, 0.0 }
0x1335   : > { %2567 = vadd.xlane.f32.xlu0 %v2566_v26 }
0x13c2   : > { %v2568_v32 = vpop.xlane.xlu0 %2567 }
0x13c3   : > { %v2569_v33 = vmul.f32 0.03125, %v2568_v32 }
0x13c5   : > { %v2570_v34 = vadd.f32 1e-05, %v2569_v33 }
0x13c7   : > { %3500 = vrsqrt.f32 %v2570_v34 }
0x13d1   : > { %v3501_v35 = vpop.eup %3500 }
0x13d2   : > { %v2572_v37 = vmul.f32 %v3501_v35, %v2564_v24 }
0x13d4   : > { %v2579_v39 = vmul.f32 %v3075_v36, %v2572_v37 }
0x13d6   : > { %v2586_v40 = vadd.f32 %v3076_v38, %v2579_v39 }
0x13d8   : > { %v2591_v41 = vpack.c.bf16 %v2586_v40, %v2586_v40 }
0x13da   : > { %3320 = vmatmul.mubr.msk.bf16.vlgmr.msra.gmra.mrb[48].mxu0 %vm1297_vm2, %v2591_v41 }
0x13db   : > { %3347 = vmatprep.mubr.msk.bf16.mxu0 %vm3610_vm0, %v3609_v1  ;;  %3344 = vmatpush3.bf16.msra.mxu0 %v3472_v11 }
0x13dc   : > { %3345 = vmatprep.subr.bf16.mxu0 %v3609_v1  ;;  %v3092_v1 = vld [vmem:[%s3809_s20] ss:$0 sm:$0xff] }
0x13df   : > { %3346 = vmatpush3.bf16.msra.mxu0 %v3473_v12 }
0x14ad   : > { %v2648_v48 = vpop.f32.mrb[48].mxu0 }
0x14ae   : > { %v2649_v49 = vadd.f32 %v3077_v47, %v2648_v48  ;;  %v3321_v50 = vpop.f32.mrb[49].mxu0 }
0x14af   : > { %v2651_v51 = vpop.f32.mrb[50].mxu0 }
0x14b0   : > { %v2655_v54 = vmul.f32 0.70710677, %v2649_v49  ;;  %v3322_v55 = vpop.f32.mrb[51].mxu0  ;;  %v2654_v57 = vmul.f32 0.5, %v2649_v49 }
0x14b2   : > { %3502 = verf.f32 %v2655_v54 }
0x14bc   : > { %v3503_v56 = vpop.eup %3502 }
0x14bd   : > { %v2657_v58 = vadd.f32 1.0, %v3503_v56 }
0x14bf   : > { %v2658_v59 = vmul.f32 %v2657_v58, %v2654_v57 }
0x14c1   : > { %v2675_v60 = vpack.c.bf16 %v2658_v59, %v2658_v59 }
0x14c3   : > { %3340 = vmatmul.mubr.bf16.vlgmr.msra.gmra.mrb[28].mxu1 %v2675_v60 }
0x1596   : > { %v2758_v61 = vpop.f32.mrb[28].mxu1 }
0x1597   : > { %v2764_v63 = vadd.f32 %v2758_v61, %v4074_v19  ;;  %v3341_v0 = vpop.f32.mrb[29].mxu1 }
0x1598   : > { %v2761_v2 = vpop.f32.mrb[30].mxu1 }
0x1599   : > { %v3342_v3 = vpop.f32.mrb[31].mxu1  ;;  %v2772_v4 = vadd.f32 %v3089_v62, %v2764_v63 }
0x159b   : > { %v2775_v5 = vsel %vm1297_vm2, %v2772_v4, 0.0 }
0x159c   : > { %2776 = vadd.xlane.f32.xlu0 %v2775_v5 }
0x1629   : > { %v2777_v6 = vpop.xlane.xlu0 %2776 }
0x162a   : > { %v2778_v7 = vmul.f32 0.03125, %v2777_v6 }
0x162c   : > { %v2779_v8 = vsub.f32 %v2772_v4, %v2778_v7 }
0x162e   : > { %v2780_v9 = vmul.f32 %v2779_v8, %v2779_v8 }
0x1630   : > { %v2781_v10 = vsel %vm1297_vm2, %v2780_v9, 0.0 }
0x1631   : > { %2782 = vadd.xlane.f32.xlu1 %v2781_v10 }
0x16be   : > { %v2783_v13 = vpop.xlane.xlu1 %2782 }
0x16bf   : > { %v2784_v14 = vmul.f32 0.03125, %v2783_v13 }
0x16c1   : > { %v2785_v28 = vadd.f32 1e-05, %v2784_v14 }
0x16c3   : > { %3504 = vrsqrt.f32 %v2785_v28 }
0x16cd   : > { %v3505_v15 = vpop.eup %3504 }
0x16ce   : > { %v2787_v16 = vmul.f32 %v3505_v15, %v2779_v8 }
0x16d0   : > { %v2794_v18 = vmul.f32 %v3090_v53, %v2787_v16 }
0x16d2   : > { %v2801_v19 = vadd.f32 %v3091_v17, %v2794_v18 }
0x16d4   : > { %v2806_v20 = vpack.c.bf16 %v2801_v19, %v2801_v19 }
0x16d6   : > { %3348 = vmatmul.mubr.msk.bf16.vlgmr.msra.gmra.mrb[52].mxu0 %vm1297_vm2, %v2806_v20 }
0x17a9   : > { %v2863_v21 = vpop.f32.mrb[52].mxu0 }
0x17aa   : > { %v2864_v22 = vadd.f32 %v3092_v1, %v2863_v21  ;;  %v3349_v23 = vpop.f32.mrb[53].mxu0 }
0x17ab   : > { %v2866_v24 = vpop.f32.mrb[54].mxu0 }
0x17ac   : > { %v3350_v25 = vpop.f32.mrb[55].mxu0  ;;  %2869 = vst.msk [vmem:[%s1199_s7] sm:$0xff] %vm1230_vm1, %v2864_v22 }
0x17ad   : > { %3519 = shalt.err (!%p3516_p3)
}
0x17ae   : > { %s3520_s7 = scalar_lea.hbm %s4119_s9, 128  ;;  %s3524_s1 = scalar_lea.hbm %s3819_s29, 256 }
0x17af   : > { %p3521_p4 = scmp.ne.s32.totalorder %s4119_s9, %s3520_s7  ;;  %p3525_p9 = scmp.lt.u32.totalorder %s4119_s9, %s3819_s29 }
0x17b0   : > { %p3526_p10 = scmp.lt.u32.totalorder %s3524_s1, %s3520_s7  ;;  %p3528_p12 = scmp.lt.u32.totalorder %s3520_s7, %s4119_s9 }
0x17b1   : > { %p3522_p7 = pnand %p3521_p4, %p3859_p5 }
0x17b2   : > { %p3527_p11 = por %p3526_p10, %p3525_p9 }
0x17b3   : > { %p3523_p8 = pneg %p3522_p7 }
0x17b4   : > { %p3529_p0 = por %p3528_p12, %p3527_p11 }
0x17b6   : > { %p3530_p13 = pnand %p3529_p0, %p3523_p8 }
0x17b8   : > { %3533 = shalt.err (!%p3530_p13)
}
0x17b9   : > { %3351 = dma.vmem_to_hbm [thread:$0]  (%p3859_p5), %s4121_s8, 128, %s4119_s9, %s2871_s3  }
0x17ba PF: > { %p3357_p1 = scmp.ge.s32.totalorder %s3568_s28, 2  ;;  %s2896_s6 = sand.u32 1, %s3556_s22  }
0x17bb   : > { %s2897_s0 = scalar_lea.sflag [#allocation3], %s2896_s6 }
0x17bc   : > { %p3354_p2 = pnand %p3357_p1, %p3863_p6 }
0x17be   : > { %3551 = dma.done.wait (!%p3354_p2), %s2897_s0, 128  }
0x17bf   : > { %3553 = vsyncadd (!%p3354_p2), %s2897_s0, 4294967168  ;;  %p89_p3 = scmp.ge.s32.totalorder %s3846_s2, 4   ;;  %s4241_s22 = smov %s3560_s23 }
0x17c0   : > { %s4242_s23 = smov %s3564_s26  ;;  %s4243_s26 = smov %s3857_s11 }
0x17c1   : > { %s4244_s28 = smov %s3846_s2  ;;  %91 = sbr.rel (!%p89_p3) target bundleno = 80 (0x50), region = 256 }
0x17c8   :  { %2902 = vsyncpa [#allocation3], 1 }
0x17c9   :  { %2904 = vsyncpa [#allocation3 + $0x1], 1 }

</bundles_post_ra>
